<compile_context>
chip_gen: v5e
topology: v5e:2x2
jax: 0.10.0
libtpu: 0.0.40
codegen_flags: <defaults>
</compile_context>

<pallas_src>
import functools

import jax
import jax.numpy as jnp
from jax.experimental import pallas as pl
from jax.experimental.pallas import tpu as pltpu

IN_FEATURES = 28 * 28          # 784
IN_PAD = 896                   # 7 * 128 (lane-dense K for layer 1)
HIDDEN = 512
OUT_FEATURES = 10
OUT_PAD = 128                  # lane-dense output width
TILE_B_MAX = 512               # rows per grid step (amortizes per-step overhead)


def _round_up(x, m):
    return ((x + m - 1) // m) * m


def mlp_kernel(x_ref, w1_ref, b1_ref, w2_ref, b2_ref, w3_ref, b3_ref, o_ref):
    # Layer 1: Linear(896 -> 512) + ReLU   (bf16 operands, f32 accumulate on MXU)
    h1 = jnp.dot(x_ref[...], w1_ref[...], preferred_element_type=jnp.float32)
    h1 = jnp.maximum(h1 + b1_ref[...], 0.0).astype(jnp.bfloat16)
    # Layer 2: Linear(512 -> 512) + ReLU
    h2 = jnp.dot(h1, w2_ref[...], preferred_element_type=jnp.float32)
    h2 = jnp.maximum(h2 + b2_ref[...], 0.0).astype(jnp.bfloat16)
    # Layer 3: Linear(512 -> 128 padded), logits (no activation)
    logits = jnp.dot(h2, w3_ref[...], preferred_element_type=jnp.float32)
    o_ref[...] = (logits + b3_ref[...]).astype(o_ref.dtype)


@jax.jit
def neural_network_forward(x, params):
    """x: (B, 28, 28) float32. Returns logits (B, 10) float32."""
    w1, b1, w2, b2, w3, b3 = params
    B = x.shape[0]

    # nn.Flatten() + lane-dense padding of the K dimension (784 -> 896).
    x2d = x.reshape(B, IN_FEATURES)
    tile_b = min(TILE_B_MAX, _round_up(B, 8))
    Bp = _round_up(B, tile_b)
    x_pad = jnp.pad(x2d, ((0, Bp - B), (0, IN_PAD - IN_FEATURES))).astype(jnp.bfloat16)

    # Weights in bf16; zero-pad w1's K dim and w3/b3's output dim.
    w1p = jnp.pad(w1, ((0, IN_PAD - IN_FEATURES), (0, 0))).astype(jnp.bfloat16)
    w2p = w2.astype(jnp.bfloat16)
    w3p = jnp.pad(w3, ((0, 0), (0, OUT_PAD - OUT_FEATURES))).astype(jnp.bfloat16)
    b1p = b1.astype(jnp.float32)
    b2p = b2.astype(jnp.float32)
    b3p = jnp.pad(b3, ((0, 0), (0, OUT_PAD - OUT_FEATURES))).astype(jnp.float32)

    grid = (Bp // tile_b,)
    flops = 2 * Bp * (IN_PAD * HIDDEN + HIDDEN * HIDDEN + HIDDEN * OUT_PAD)
    bytes_accessed = (
        x_pad.size * 2
        + (w1p.size + w2p.size + w3p.size) * 2
        + (b1p.size + b2p.size + b3p.size) * 4
        + Bp * OUT_PAD * 4
    )

    out = pl.pallas_call(
        mlp_kernel,
        out_shape=jax.ShapeDtypeStruct((Bp, OUT_PAD), jnp.float32),
        grid=grid,
        in_specs=[
            pl.BlockSpec((tile_b, IN_PAD), lambda i: (i, 0)),     # x tile (moves)
            pl.BlockSpec((IN_PAD, HIDDEN), lambda i: (0, 0)),     # w1 (pinned)
            pl.BlockSpec((1, HIDDEN), lambda i: (0, 0)),          # b1 (pinned)
            pl.BlockSpec((HIDDEN, HIDDEN), lambda i: (0, 0)),     # w2 (pinned)
            pl.BlockSpec((1, HIDDEN), lambda i: (0, 0)),          # b2 (pinned)
            pl.BlockSpec((HIDDEN, OUT_PAD), lambda i: (0, 0)),    # w3 (pinned)
            pl.BlockSpec((1, OUT_PAD), lambda i: (0, 0)),         # b3 (pinned)
        ],
        out_specs=pl.BlockSpec((tile_b, OUT_PAD), lambda i: (i, 0)),
        compiler_params=pltpu.CompilerParams(
            dimension_semantics=("parallel",),                    # megacore on v7x
            vmem_limit_bytes=64 << 20,
        ),
        cost_estimate=pl.CostEstimate(
            flops=flops, transcendentals=0, bytes_accessed=bytes_accessed
        ),
    )(x_pad, w1p, b1p, w2p, b2p, w3p, b3p)

    # Strip batch padding and the lane padding of the 10-wide output.
    return out[:B, :OUT_FEATURES]


def init_params(key):
    """Deterministic init matching nn.Linear shapes (stored as (in, out) for x @ W)."""
    k1, k2, k3, k4, k5, k6 = jax.random.split(key, 6)
    s1 = 1.0 / jnp.sqrt(IN_FEATURES)
    s2 = 1.0 / jnp.sqrt(HIDDEN)
    w1 = jax.random.uniform(k1, (IN_FEATURES, HIDDEN), jnp.float32, -s1, s1)
    b1 = jax.random.uniform(k2, (1, HIDDEN), jnp.float32, -s1, s1)
    w2 = jax.random.uniform(k3, (HIDDEN, HIDDEN), jnp.float32, -s2, s2)
    b2 = jax.random.uniform(k4, (1, HIDDEN), jnp.float32, -s2, s2)
    w3 = jax.random.uniform(k5, (HIDDEN, OUT_FEATURES), jnp.float32, -s2, s2)
    b3 = jax.random.uniform(k6, (1, OUT_FEATURES), jnp.float32, -s2, s2)
    return (w1, b1, w2, b2, w3, b3)


if __name__ == "__main__":
    key = jax.random.PRNGKey(0)
    kx, kp = jax.random.split(key)

    B = 2
    x = jax.random.uniform(kx, (B, 28, 28), jnp.float32)  # like torch.rand(B, 28, 28)
    params = init_params(kp)

    logits = neural_network_forward(x, params)
    logits = jax.block_until_ready(logits)

    # Reference 1: same bf16-rounded operands, f32 math (tight check on kernel plumbing).
    w1, b1, w2, b2, w3, b3 = params
    x2d = x.reshape(B, IN_FEATURES)
    xb = x2d.astype(jnp.bfloat16).astype(jnp.float32)
    w1b = w1.astype(jnp.bfloat16).astype(jnp.float32)
    w2b = w2.astype(jnp.bfloat16).astype(jnp.float32)
    w3b = w3.astype(jnp.bfloat16).astype(jnp.float32)
    r = jnp.maximum(xb @ w1b + b1, 0.0).astype(jnp.bfloat16).astype(jnp.float32)
    r = jnp.maximum(r @ w2b + b2, 0.0).astype(jnp.bfloat16).astype(jnp.float32)
    ref_bf16 = r @ w3b + b3

    # Reference 2: pure f32 math (loose check on overall accuracy).
    r32 = jnp.maximum(x2d @ w1 + b1, 0.0)
    r32 = jnp.maximum(r32 @ w2 + b2, 0.0)
    ref_f32 = r32 @ w3 + b3

    assert logits.shape == (B, OUT_FEATURES)
    assert jnp.allclose(logits, ref_bf16, atol=5e-3, rtol=5e-3)
    assert jnp.allclose(logits, ref_f32, atol=5e-2, rtol=5e-2)

    print("KERNEL_OK")
</pallas_src>

<mosaic_0001>
module attributes {stable_mosaic.version = 11 : i64} {
  func.func @mlp_kernel(%arg0: i32, %arg1: memref<8x896xbf16, #tpu.memory_space<vmem>>, %arg2: memref<896x512xbf16, #tpu.memory_space<vmem>>, %arg3: memref<1x512xf32, #tpu.memory_space<vmem>>, %arg4: memref<512x512xbf16, #tpu.memory_space<vmem>>, %arg5: memref<1x512xf32, #tpu.memory_space<vmem>>, %arg6: memref<512x128xbf16, #tpu.memory_space<vmem>>, %arg7: memref<1x128xf32, #tpu.memory_space<vmem>>, %arg8: memref<8x128xf32, #tpu.memory_space<vmem>>) attributes {dimension_semantics = [#tpu.dimension_semantics<parallel>], iteration_bounds = array<i64: 1>, scalar_prefetch = 0 : i64, scratch_operands = 0 : i64, tpu.core_type = #tpu.core_type<tc>, window_params = [{transform_indices = @transform_0, window_bounds = array<i64: 8, 896>}, {pipeline_mode = #tpu.pipeline_mode<synchronous>, transform_indices = @transform_1, window_bounds = array<i64: 896, 512>}, {pipeline_mode = #tpu.pipeline_mode<synchronous>, transform_indices = @transform_2, window_bounds = array<i64: 1, 512>}, {pipeline_mode = #tpu.pipeline_mode<synchronous>, transform_indices = @transform_3, window_bounds = array<i64: 512, 512>}, {pipeline_mode = #tpu.pipeline_mode<synchronous>, transform_indices = @transform_4, window_bounds = array<i64: 1, 512>}, {pipeline_mode = #tpu.pipeline_mode<synchronous>, transform_indices = @transform_5, window_bounds = array<i64: 512, 128>}, {pipeline_mode = #tpu.pipeline_mode<synchronous>, transform_indices = @transform_6, window_bounds = array<i64: 1, 128>}, {transform_indices = @transform_7, window_bounds = array<i64: 8, 128>}]} {
    %c0 = arith.constant 0 : index
    %c0_0 = arith.constant 0 : index
    %0 = vector.load %arg1[%c0, %c0_0] : memref<8x896xbf16, #tpu.memory_space<vmem>>, vector<8x896xbf16>
    %c0_1 = arith.constant 0 : index
    %c0_2 = arith.constant 0 : index
    %1 = vector.load %arg2[%c0_1, %c0_2] : memref<896x512xbf16, #tpu.memory_space<vmem>>, vector<896x512xbf16>
    %cst = arith.constant dense<0.000000e+00> : vector<8x512xf32>
    %2 = tpu.matmul %0, %1, %cst {dimension_numbers = #tpu.dot_dimension_numbers<[1], [0], [0], [1], [0, 0, 1, 1], [], []>} : vector<8x896xbf16>, vector<896x512xbf16>, vector<8x512xf32> -> vector<8x512xf32>
    %c0_3 = arith.constant 0 : index
    %c0_4 = arith.constant 0 : index
    %3 = vector.load %arg3[%c0_3, %c0_4] : memref<1x512xf32, #tpu.memory_space<vmem>>, vector<1x512xf32>
    %4 = vector.broadcast %3 : vector<1x512xf32> to vector<8x512xf32>
    %5 = arith.addf %2, %4 : vector<8x512xf32>
    %cst_5 = arith.constant 0.000000e+00 : f32
    %6 = vector.broadcast %cst_5 : f32 to vector<8x512xf32>
    %7 = arith.maximumf %5, %6 : vector<8x512xf32>
    %8 = arith.truncf %7 : vector<8x512xf32> to vector<8x512xbf16>
    %c0_6 = arith.constant 0 : index
    %c0_7 = arith.constant 0 : index
    %9 = vector.load %arg4[%c0_6, %c0_7] : memref<512x512xbf16, #tpu.memory_space<vmem>>, vector<512x512xbf16>
    %cst_8 = arith.constant dense<0.000000e+00> : vector<8x512xf32>
    %10 = tpu.matmul %8, %9, %cst_8 {dimension_numbers = #tpu.dot_dimension_numbers<[1], [0], [0], [1], [0, 0, 1, 1], [], []>} : vector<8x512xbf16>, vector<512x512xbf16>, vector<8x512xf32> -> vector<8x512xf32>
    %c0_9 = arith.constant 0 : index
    %c0_10 = arith.constant 0 : index
    %11 = vector.load %arg5[%c0_9, %c0_10] : memref<1x512xf32, #tpu.memory_space<vmem>>, vector<1x512xf32>
    %12 = vector.broadcast %11 : vector<1x512xf32> to vector<8x512xf32>
    %13 = arith.addf %10, %12 : vector<8x512xf32>
    %cst_11 = arith.constant 0.000000e+00 : f32
    %14 = vector.broadcast %cst_11 : f32 to vector<8x512xf32>
    %15 = arith.maximumf %13, %14 : vector<8x512xf32>
    %16 = arith.truncf %15 : vector<8x512xf32> to vector<8x512xbf16>
    %c0_12 = arith.constant 0 : index
    %c0_13 = arith.constant 0 : index
    %17 = vector.load %arg6[%c0_12, %c0_13] : memref<512x128xbf16, #tpu.memory_space<vmem>>, vector<512x128xbf16>
    %cst_14 = arith.constant dense<0.000000e+00> : vector<8x128xf32>
    %18 = tpu.matmul %16, %17, %cst_14 {dimension_numbers = #tpu.dot_dimension_numbers<[1], [0], [0], [1], [0, 0, 1, 1], [], []>} : vector<8x512xbf16>, vector<512x128xbf16>, vector<8x128xf32> -> vector<8x128xf32>
    %c0_15 = arith.constant 0 : index
    %c0_16 = arith.constant 0 : index
    %19 = vector.load %arg7[%c0_15, %c0_16] : memref<1x128xf32, #tpu.memory_space<vmem>>, vector<1x128xf32>
    %20 = vector.broadcast %19 : vector<1x128xf32> to vector<8x128xf32>
    %21 = arith.addf %18, %20 : vector<8x128xf32>
    %c0_17 = arith.constant 0 : index
    %c0_18 = arith.constant 0 : index
    %22 = vector.load %arg8[%c0_17, %c0_18] : memref<8x128xf32, #tpu.memory_space<vmem>>, vector<8x128xf32>
    tpu.vector_store %arg8[%c0_17, %c0_18], %21 {strides = array<i32>} : memref<8x128xf32, #tpu.memory_space<vmem>>, vector<8x128xf32>,
    return
  }
  func.func @transform_0(%arg0: i32) -> (i32, i32) {
    %c0_i32 = arith.constant 0 : i32
    %c0_i32_0 = arith.constant 0 : i32
    return %arg0, %c0_i32 : i32, i32
  }
  func.func @transform_1(%arg0: i32) -> (i32, i32) {
    %c0_i32 = arith.constant 0 : i32
    %c0_i32_0 = arith.constant 0 : i32
    %c0_i32_1 = arith.constant 0 : i32
    return %c0_i32, %c0_i32_0 : i32, i32
  }
  func.func @transform_2(%arg0: i32) -> (i32, i32) {
    %c0_i32 = arith.constant 0 : i32
    %c0_i32_0 = arith.constant 0 : i32
    %c0_i32_1 = arith.constant 0 : i32
    return %c0_i32, %c0_i32_0 : i32, i32
  }
  func.func @transform_3(%arg0: i32) -> (i32, i32) {
    %c0_i32 = arith.constant 0 : i32
    %c0_i32_0 = arith.constant 0 : i32
    %c0_i32_1 = arith.constant 0 : i32
    return %c0_i32, %c0_i32_0 : i32, i32
  }
  func.func @transform_4(%arg0: i32) -> (i32, i32) {
    %c0_i32 = arith.constant 0 : i32
    %c0_i32_0 = arith.constant 0 : i32
    %c0_i32_1 = arith.constant 0 : i32
    return %c0_i32, %c0_i32_0 : i32, i32
  }
  func.func @transform_5(%arg0: i32) -> (i32, i32) {
    %c0_i32 = arith.constant 0 : i32
    %c0_i32_0 = arith.constant 0 : i32
    %c0_i32_1 = arith.constant 0 : i32
    return %c0_i32, %c0_i32_0 : i32, i32
  }
  func.func @transform_6(%arg0: i32) -> (i32, i32) {
    %c0_i32 = arith.constant 0 : i32
    %c0_i32_0 = arith.constant 0 : i32
    %c0_i32_1 = arith.constant 0 : i32
    return %c0_i32, %c0_i32_0 : i32, i32
  }
  func.func @transform_7(%arg0: i32) -> (i32, i32) {
    %c0_i32 = arith.constant 0 : i32
    %c0_i32_0 = arith.constant 0 : i32
    return %arg0, %c0_i32 : i32, i32
  }
}

</mosaic_0001>

<bundles_post_ra>
// kernel: neural_network_forward.1
= control target key start
LH: loop header
LB: loop body
LE: loop exit
PB: predicated region body
PF: predicated region fallthrough
CT: control target
= control target key end

     0   :  { %s7432_s1 = inlined_call_operand.vmem [shape: bf16[896,512], index: 1, kind: input, shape index: {}]   ;;  %s7433_s0 = inlined_call_operand.vmem [shape: bf16[8,896], index: 0, kind: input, shape index: {}]   ;;  %s7434_s2 = inlined_call_operand.vmem [shape: f32[1,512], index: 2, kind: input, shape index: {}]   ;;  %s7435_s3 = inlined_call_operand.vmem [shape: bf16[512,512], index: 3, kind: input, shape index: {}]   ;;  %s7436_s4 = inlined_call_operand.vmem [shape: f32[1,512], index: 4, kind: input, shape index: {}]   ;;  %s7437_s5 = inlined_call_operand.vmem [shape: bf16[512,128], index: 5, kind: input, shape index: {}]   ;;  %s7438_s6 = inlined_call_operand.vmem [shape: f32[1,128], index: 6, kind: input, shape index: {}]   ;;  %s7439_s7 = inlined_call_operand.vmem [shape: f32[8,128], index: 7, kind: output, shape index: {}]  }
   0x1   :  { %v3206_v0 = vld [vmem:[%s7432_s1 + $0xe0] sm:$0xf]  ;;  %v4658_v1 = vld [vmem:[%s7432_s1 + $0xec] sm:$0xf0] }
   0x2   :  { %v3334_v2 = vld [vmem:[%s7432_s1 + $0x1e0] sm:$0xf]  ;;  %v3207_v3 = vor.u32 %v4658_v1, %v3206_v0  ;;  %v4690_v4 = vld [vmem:[%s7432_s1 + $0x1ec] sm:$0xf0] }
   0x3   :  { %v3462_v5 = vld [vmem:[%s7432_s1 + $0x2e0] sm:$0xf]  ;;  %v4722_v6 = vld [vmem:[%s7432_s1 + $0x2ec] sm:$0xf0]  ;;  %v3335_v7 = vor.u32 %v4690_v4, %v3334_v2 }
   0x4   :  { %v3463_v8 = vor.u32 %v4722_v6, %v3462_v5  ;;  %v3590_v9 = vld [vmem:[%s7432_s1 + $0x3e0] sm:$0xf]  ;;  %v4754_v10 = vld [vmem:[%s7432_s1 + $0x3ec] sm:$0xf0]  ;;  %1409 = vmatpush.bf16.msra.mxu0 %v3207_v3 }
   0x5   :  { %v3190_v11 = vld [vmem:[%s7432_s1 + $0xc0] sm:$0xf]  ;;  %v3591_v12 = vor.u32 %v4754_v10, %v3590_v9  ;;  %v4654_v13 = vld [vmem:[%s7432_s1 + $0xcc] sm:$0xf0]  ;;  %1422 = vmatpush.bf16.msra.mxu1 %v3335_v7 }
   0x6   :  { %v3318_v14 = vld [vmem:[%s7432_s1 + $0x1c0] sm:$0xf]  ;;  %v4686_v15 = vld [vmem:[%s7432_s1 + $0x1cc] sm:$0xf0]  ;;  %1435 = vmatpush.bf16.msra.mxu2 %v3463_v8  ;;  %v3191_v16 = vor.u32 %v4654_v13, %v3190_v11 }
   0x7   :  { %v3319_v17 = vor.u32 %v4686_v15, %v3318_v14  ;;  %v3446_v18 = vld [vmem:[%s7432_s1 + $0x2c0] sm:$0xf]  ;;  %v4718_v19 = vld [vmem:[%s7432_s1 + $0x2cc] sm:$0xf0]  ;;  %1448 = vmatpush.bf16.msra.mxu3 %v3591_v12 }
   0x8   :  { %v3574_v20 = vld [vmem:[%s7432_s1 + $0x3c0] sm:$0xf]  ;;  %v3447_v21 = vor.u32 %v4718_v19, %v3446_v18  ;;  %v4750_v22 = vld [vmem:[%s7432_s1 + $0x3cc] sm:$0xf0]  ;;  %1410 = vmatpush.bf16.msra.mxu0 %v3191_v16 }
   0x9   :  { %v3174_v23 = vld [vmem:[%s7432_s1 + $0xa0] sm:$0xf]  ;;  %v4650_v24 = vld [vmem:[%s7432_s1 + $0xac] sm:$0xf0]  ;;  %v3575_v25 = vor.u32 %v4750_v22, %v3574_v20  ;;  %1423 = vmatpush.bf16.msra.mxu1 %v3319_v17 }
   0xa   :  { %v3302_v26 = vld [vmem:[%s7432_s1 + $0x1a0] sm:$0xf]  ;;  %v4682_v27 = vld [vmem:[%s7432_s1 + $0x1ac] sm:$0xf0]  ;;  %v3175_v29 = vor.u32 %v4650_v24, %v3174_v23  ;;  %1436 = vmatpush.bf16.msra.mxu2 %v3447_v21 }
   0xb   :  { %v3430_v28 = vld [vmem:[%s7432_s1 + $0x2a0] sm:$0xf]  ;;  %v4714_v30 = vld [vmem:[%s7432_s1 + $0x2ac] sm:$0xf0]  ;;  %v3303_v33 = vor.u32 %v4682_v27, %v3302_v26  ;;  %1449 = vmatpush.bf16.msra.mxu3 %v3575_v25 }
   0xc   :  { %v3558_v31 = vld [vmem:[%s7432_s1 + $0x3a0] sm:$0xf]  ;;  %v4746_v32 = vld [vmem:[%s7432_s1 + $0x3ac] sm:$0xf0]  ;;  %v3431_v34 = vor.u32 %v4714_v30, %v3430_v28  ;;  %1411 = vmatpush.bf16.msra.mxu0 %v3175_v29 }
   0xd   :  { %v3158_v35 = vld [vmem:[%s7432_s1 + $0x80] sm:$0xf]  ;;  %v4646_v36 = vld [vmem:[%s7432_s1 + $0x8c] sm:$0xf0]  ;;  %v3559_v38 = vor.u32 %v4746_v32, %v3558_v31  ;;  %1424 = vmatpush.bf16.msra.mxu1 %v3303_v33 }
   0xe   :  { %v3286_v37 = vld [vmem:[%s7432_s1 + $0x180] sm:$0xf]  ;;  %v4678_v39 = vld [vmem:[%s7432_s1 + $0x18c] sm:$0xf0]  ;;  %v3159_v44 = vor.u32 %v4646_v36, %v3158_v35  ;;  %1437 = vmatpush.bf16.msra.mxu2 %v3431_v34 }
   0xf   :  { %v3414_v40 = vld [vmem:[%s7432_s1 + $0x280] sm:$0xf]  ;;  %v4710_v41 = vld [vmem:[%s7432_s1 + $0x28c] sm:$0xf0]  ;;  %v3287_v45 = vor.u32 %v4678_v39, %v3286_v37  ;;  %1450 = vmatpush.bf16.msra.mxu3 %v3559_v38  ;;  %v4656_v37 = vld [vmem:[%s7432_s1 + $0xe4] sm:$0xf] }
  0x10   :  { %v3542_v42 = vld [vmem:[%s7432_s1 + $0x380] sm:$0xf]  ;;  %v4742_v43 = vld [vmem:[%s7432_s1 + $0x38c] sm:$0xf0]  ;;  %v3415_v46 = vor.u32 %v4710_v41, %v3414_v40  ;;  %1412 = vmatpush.bf16.msra.mxu0 %v3159_v44  ;;  %v3208_v38 = vld [vmem:[%s7432_s1 + $0xf0] sm:$0xf0] }
  0x11   :  { %v3142_v47 = vld [vmem:[%s7432_s1 + $0x60] sm:$0xf]  ;;  %v4642_v48 = vld [vmem:[%s7432_s1 + $0x6c] sm:$0xf0]  ;;  %v3543_v50 = vor.u32 %v4742_v43, %v3542_v42  ;;  %1425 = vmatpush.bf16.msra.mxu1 %v3287_v45 }
  0x12   :  { %v3270_v49 = vld [vmem:[%s7432_s1 + $0x160] sm:$0xf]  ;;  %v4674_v51 = vld [vmem:[%s7432_s1 + $0x16c] sm:$0xf0]  ;;  %v3143_v56 = vor.u32 %v4642_v48, %v3142_v47  ;;  %1438 = vmatpush.bf16.msra.mxu2 %v3415_v46  ;;  %v3211_v46 = vor.u32 %v4656_v37, %v3208_v38 }
  0x13   :  { %v3398_v52 = vld [vmem:[%s7432_s1 + $0x260] sm:$0xf]  ;;  %v4706_v53 = vld [vmem:[%s7432_s1 + $0x26c] sm:$0xf0]  ;;  %v3271_v57 = vor.u32 %v4674_v51, %v3270_v49  ;;  %1451 = vmatpush.bf16.msra.mxu3 %v3543_v50  ;;  %v4652_v50 = vld [vmem:[%s7432_s1 + $0xc4] sm:$0xf] }
  0x14   :  { %v3526_v54 = vld [vmem:[%s7432_s1 + $0x360] sm:$0xf]  ;;  %v4738_v55 = vld [vmem:[%s7432_s1 + $0x36c] sm:$0xf0]  ;;  %v3399_v58 = vor.u32 %v4706_v53, %v3398_v52  ;;  %1413 = vmatpush.bf16.msra.mxu0 %v3143_v56  ;;  %v3192_v51 = vld [vmem:[%s7432_s1 + $0xd0] sm:$0xf0] }
  0x15   :  { %v3126_v59 = vld [vmem:[%s7432_s1 + $0x40] sm:$0xf]  ;;  %v4638_v60 = vld [vmem:[%s7432_s1 + $0x4c] sm:$0xf0]  ;;  %v3527_v62 = vor.u32 %v4738_v55, %v3526_v54  ;;  %1426 = vmatpush.bf16.msra.mxu1 %v3271_v57 }
  0x16   :  { %v3254_v61 = vld [vmem:[%s7432_s1 + $0x140] sm:$0xf]  ;;  %v4670_v63 = vld [vmem:[%s7432_s1 + $0x14c] sm:$0xf0]  ;;  %v3127_v4 = vor.u32 %v4638_v60, %v3126_v59  ;;  %1439 = vmatpush.bf16.msra.mxu2 %v3399_v58  ;;  %v3195_v59 = vor.u32 %v4652_v50, %v3192_v51 }
  0x17   :  { %v3382_v0 = vld [vmem:[%s7432_s1 + $0x240] sm:$0xf]  ;;  %v4702_v1 = vld [vmem:[%s7432_s1 + $0x24c] sm:$0xf0]  ;;  %v3255_v5 = vor.u32 %v4670_v63, %v3254_v61  ;;  %1452 = vmatpush.bf16.msra.mxu3 %v3527_v62  ;;  %v4648_v62 = vld [vmem:[%s7432_s1 + $0xa4] sm:$0xf] }
  0x18   :  { %v3510_v2 = vld [vmem:[%s7432_s1 + $0x340] sm:$0xf]  ;;  %v4734_v3 = vld [vmem:[%s7432_s1 + $0x34c] sm:$0xf0]  ;;  %v3383_v6 = vor.u32 %v4702_v1, %v3382_v0  ;;  %1414 = vmatpush.bf16.msra.mxu0 %v3127_v4  ;;  %v3176_v63 = vld [vmem:[%s7432_s1 + $0xb0] sm:$0xf0] }
  0x19   :  { %v3110_v7 = vld [vmem:[%s7432_s1 + $0x20] sm:$0xf]  ;;  %v4634_v8 = vld [vmem:[%s7432_s1 + $0x2c] sm:$0xf0]  ;;  %v3511_v10 = vor.u32 %v4734_v3, %v3510_v2  ;;  %1427 = vmatpush.bf16.msra.mxu1 %v3255_v5  ;;  %v27_v2 = vld [vmem:[%s7433_s0 + $0x8] sm:$0xff] }
  0x1a   :  { %v3238_v9 = vld [vmem:[%s7432_s1 + $0x120] sm:$0xf]  ;;  %v4666_v11 = vld [vmem:[%s7432_s1 + $0x12c] sm:$0xf0]  ;;  %v3111_v16 = vor.u32 %v4634_v8, %v3110_v7  ;;  %1440 = vmatpush.bf16.msra.mxu2 %v3383_v6  ;;  %v270_v8 = vunpack.c.l.b16 %v27_v2 }
  0x1b   :  { %v3366_v12 = vld [vmem:[%s7432_s1 + $0x220] sm:$0xf]  ;;  %v4698_v13 = vld [vmem:[%s7432_s1 + $0x22c] sm:$0xf0]  ;;  %v3239_v19 = vor.u32 %v4666_v11, %v3238_v9  ;;  %1453 = vmatpush.bf16.msra.mxu3 %v3511_v10  ;;  %v271_v10 = vunpack.c.h.b16 %v27_v2  ;;  %v3179_v11 = vor.u32 %v4648_v62, %v3176_v63 }
  0x1c   :  { %v3494_v14 = vld [vmem:[%s7432_s1 + $0x320] sm:$0xf]  ;;  %v4730_v15 = vld [vmem:[%s7432_s1 + $0x32c] sm:$0xf0]  ;;  %v3367_v20 = vor.u32 %v4698_v13, %v3366_v12  ;;  %1415 = vmatpush.bf16.msra.mxu0 %v3111_v16  ;;  %v4644_v16 = vld [vmem:[%s7432_s1 + $0x84] sm:$0xf] }
  0x1d   :  { %v3094_v17 = vld [vmem:[%s7432_s1] sm:$0xf]  ;;  %v4630_v18 = vld [vmem:[%s7432_s1 + $0xc] sm:$0xf0]  ;;  %v3495_v24 = vor.u32 %v4730_v15, %v3494_v14  ;;  %1428 = vmatpush.bf16.msra.mxu1 %v3239_v19 }
  0x1e   :  { %v3222_v21 = vld [vmem:[%s7432_s1 + $0x100] sm:$0xf]  ;;  %v4662_v22 = vld [vmem:[%s7432_s1 + $0x10c] sm:$0xf0]  ;;  %v3095_v31 = vor.u32 %v4630_v18, %v3094_v17  ;;  %1441 = vmatpush.bf16.msra.mxu2 %v3367_v20  ;;  %v3160_v17 = vld [vmem:[%s7432_s1 + $0x90] sm:$0xf0]  ;;  %v5348_v18 = vpack.c.b16 %v270_v8, %v270_v8  ;;  %v5352_v20 = vpack.c.b16 %v271_v10, %v271_v10 }
  0x1f   :  { %v3350_v23 = vld [vmem:[%s7432_s1 + $0x200] sm:$0xf]  ;;  %v4694_v25 = vld [vmem:[%s7432_s1 + $0x20c] sm:$0xf0]  ;;  %v3223_v35 = vor.u32 %v4662_v22, %v3222_v21  ;;  %1454 = vmatpush.bf16.msra.mxu3 %v3495_v24  ;;  %v4688_v8 = vld [vmem:[%s7432_s1 + $0x1e4] sm:$0xf] }
  0x20   :  { %v3478_v26 = vld [vmem:[%s7432_s1 + $0x300] sm:$0xf]  ;;  %v4726_v27 = vld [vmem:[%s7432_s1 + $0x30c] sm:$0xf0]  ;;  %v3351_v36 = vor.u32 %v4694_v25, %v3350_v23  ;;  %1416 = vmatpush.bf16.msra.mxu0 %v3095_v31  ;;  %v4720_v10 = vld [vmem:[%s7432_s1 + $0x2e4] sm:$0xf] }
  0x21   :  { %v3718_v28 = vld [vmem:[%s7432_s1 + $0x4e0] sm:$0xf]  ;;  %v4786_v29 = vld [vmem:[%s7432_s1 + $0x4ec] sm:$0xf0]  ;;  %v3479_v39 = vor.u32 %v4726_v27, %v3478_v26  ;;  %1429 = vmatpush.bf16.msra.mxu1 %v3223_v35 }
  0x22   :  { %v3846_v30 = vld [vmem:[%s7432_s1 + $0x5e0] sm:$0xf]  ;;  %v4818_v32 = vld [vmem:[%s7432_s1 + $0x5ec] sm:$0xf0]  ;;  %v3719_v40 = vor.u32 %v4786_v29, %v3718_v28  ;;  %1442 = vmatpush.bf16.msra.mxu2 %v3351_v36  ;;  %v3163_v28 = vor.u32 %v4644_v16, %v3160_v17 }
  0x23   :  { %v3974_v33 = vld [vmem:[%s7432_s1 + $0x6e0] sm:$0xf]  ;;  %v4850_v34 = vld [vmem:[%s7432_s1 + $0x6ec] sm:$0xf0]  ;;  %v3847_v41 = vor.u32 %v4818_v32, %v3846_v30  ;;  %1455 = vmatpush.bf16.msra.mxu3 %v3479_v39  ;;  %v4640_v32 = vld [vmem:[%s7432_s1 + $0x64] sm:$0xf] }
  0x24   :  { %v3975_v42 = vor.u32 %v4850_v34, %v3974_v33  ;;  %v3702_v43 = vld [vmem:[%s7432_s1 + $0x4c0] sm:$0xf]  ;;  %v4782_v44 = vld [vmem:[%s7432_s1 + $0x4cc] sm:$0xf0]  ;;  %1461 = vmatpush.bf16.msrb.mxu0 %v3719_v40  ;;  %v3144_v33 = vld [vmem:[%s7432_s1 + $0x70] sm:$0xf0] }
  0x25   :  { %v3830_v45 = vld [vmem:[%s7432_s1 + $0x5c0] sm:$0xf]  ;;  %v4814_v47 = vld [vmem:[%s7432_s1 + $0x5cc] sm:$0xf0]  ;;  %v3703_v52 = vor.u32 %v4782_v44, %v3702_v43  ;;  %1474 = vmatpush.bf16.msrb.mxu1 %v3847_v41  ;;  %1443 = vmatmul.bf16.vlgmr.msra.gmra.mxu2 %v5348_v18  ;;  %v3147_v40 = vor.u32 %v4640_v32, %v3144_v33  ;;  %v4636_v44 = vld [vmem:[%s7432_s1 + $0x44] sm:$0xf] }
  0x26   :  { %v3958_v48 = vld [vmem:[%s7432_s1 + $0x6c0] sm:$0xf]  ;;  %v4846_v49 = vld [vmem:[%s7432_s1 + $0x6cc] sm:$0xf0]  ;;  %1487 = vmatpush.bf16.msrb.mxu2 %v3975_v42  ;;  %v3831_v54 = vor.u32 %v4814_v47, %v3830_v45  ;;  %1456 = vmatmul.bf16.vlgmr.msra.gmra.mxu3 %v5352_v20  ;;  %v3128_v45 = vld [vmem:[%s7432_s1 + $0x50] sm:$0xf0] }
  0x27   :  { %v3686_v53 = vld [vmem:[%s7432_s1 + $0x4a0] sm:$0xf]  ;;  %v3959_v55 = vor.u32 %v4846_v49, %v3958_v48  ;;  %v4778_v56 = vld [vmem:[%s7432_s1 + $0x4ac] sm:$0xf0]  ;;  %1500 = vmatpush.bf16.msrb.mxu3 %v3211_v46  ;;  %v4716_v32 = vld [vmem:[%s7432_s1 + $0x2c4] sm:$0xf] }
  0x28   :  { %v3814_v57 = vld [vmem:[%s7432_s1 + $0x5a0] sm:$0xf]  ;;  %v4810_v58 = vld [vmem:[%s7432_s1 + $0x5ac] sm:$0xf0]  ;;  %1462 = vmatpush.bf16.msrb.mxu0 %v3703_v52  ;;  %v3687_v0 = vor.u32 %v4778_v56, %v3686_v53  ;;  %v3131_v52 = vor.u32 %v4636_v44, %v3128_v45  ;;  %v4632_v56 = vld [vmem:[%s7432_s1 + $0x24] sm:$0xf] }
  0x29   :  { %v3942_v60 = vld [vmem:[%s7432_s1 + $0x6a0] sm:$0xf]  ;;  %v4842_v61 = vld [vmem:[%s7432_s1 + $0x6ac] sm:$0xf0]  ;;  %v3815_v1 = vor.u32 %v4810_v58, %v3814_v57  ;;  %1475 = vmatpush.bf16.msrb.mxu1 %v3831_v54  ;;  %v3112_v57 = vld [vmem:[%s7432_s1 + $0x30] sm:$0xf0] }
  0x2a   :  { %v26_v3 = vld [vmem:[%s7433_s0] sm:$0xff]  ;;  %1488 = vmatpush.bf16.msrb.mxu2 %v3959_v55  ;;  %v3943_v4 = vor.u32 %v4842_v61, %v3942_v60  ;;  %v4774_v6 = vld [vmem:[%s7432_s1 + $0x48c] sm:$0xf0] }
  0x2b   :  { %v3670_v5 = vld [vmem:[%s7432_s1 + $0x480] sm:$0xf]  ;;  %v268_v9 = vunpack.c.l.b16 %v26_v3  ;;  %1501 = vmatpush.bf16.msrb.mxu3 %v3195_v59  ;;  %v4806_v12 = vld [vmem:[%s7432_s1 + $0x58c] sm:$0xf0]  ;;  %v269_v15 = vunpack.c.h.b16 %v26_v3  ;;  %v29_v3 = vld [vmem:[%s7433_s0 + $0x18] sm:$0xf] }
  0x2c   :  { %v3798_v7 = vld [vmem:[%s7432_s1 + $0x580] sm:$0xf]  ;;  %v4838_v14 = vld [vmem:[%s7432_s1 + $0x68c] sm:$0xf0]  ;;  %1463 = vmatpush.bf16.msrb.mxu0 %v3687_v0  ;;  %v3671_v21 = vor.u32 %v4774_v6, %v3670_v5  ;;  %v4628_v5 = vld [vmem:[%s7432_s1 + $0x4] sm:$0xf] }
  0x2d   :  { %v3926_v13 = vld [vmem:[%s7432_s1 + $0x680] sm:$0xf]  ;;  %v5350_v19 = vpack.c.b16 %v268_v9, %v268_v9  ;;  %v5354_v22 = vpack.c.b16 %v269_v15, %v269_v15  ;;  %1476 = vmatpush.bf16.msrb.mxu1 %v3815_v1  ;;  %v3799_v23 = vor.u32 %v4806_v12, %v3798_v7  ;;  %v4770_v26 = vld [vmem:[%s7432_s1 + $0x46c] sm:$0xf0]  ;;  %v3096_v6 = vld [vmem:[%s7432_s1 + $0x10] sm:$0xf0]  ;;  %v274_v15 = vunpack.c.l.b16 %v29_v3 }
  0x2e   :  { %1489 = vmatpush.bf16.msrb.mxu2 %v3943_v4  ;;  %v3927_v24 = vor.u32 %v4838_v14, %v3926_v13  ;;  %v3654_v25 = vld [vmem:[%s7432_s1 + $0x460] sm:$0xf]  ;;  %v4802_v29 = vld [vmem:[%s7432_s1 + $0x56c] sm:$0xf0]  ;;  %v3115_v4 = vor.u32 %v4632_v56, %v3112_v57  ;;  %v3336_v9 = vld [vmem:[%s7432_s1 + $0x1f0] sm:$0xf0] }
  0x2f   :  { %v3782_v27 = vld [vmem:[%s7432_s1 + $0x560] sm:$0xf]  ;;  %1502 = vmatpush.bf16.msrb.mxu3 %v3179_v11  ;;  %v4834_v31 = vld [vmem:[%s7432_s1 + $0x66c] sm:$0xf0]  ;;  %1417 = vmatmul.bf16.vlgmr.msra.gmra.mxu0 %v5350_v19  ;;  %v3655_v34 = vor.u32 %v4770_v26, %v3654_v25  ;;  %v3464_v12 = vld [vmem:[%s7432_s1 + $0x2f0] sm:$0xf0]  ;;  %v3099_v26 = vor.u32 %v4628_v5, %v3096_v6 }
  0x30   :  { %v3910_v30 = vld [vmem:[%s7432_s1 + $0x660] sm:$0xf]  ;;  %1464 = vmatpush.bf16.msrb.mxu0 %v3671_v21  ;;  %1430 = vmatmul.bf16.vlgmr.msra.gmra.mxu1 %v5354_v22  ;;  %v3783_v35 = vor.u32 %v4802_v29, %v3782_v27  ;;  %v4766_v38 = vld [vmem:[%s7432_s1 + $0x44c] sm:$0xf0]  ;;  %v4752_v13 = vld [vmem:[%s7432_s1 + $0x3e4] sm:$0xf]  ;;  %v3339_v27 = vor.u32 %v4688_v8, %v3336_v9 }
  0x31   :  { %1477 = vmatpush.bf16.msrb.mxu1 %v3799_v23  ;;  %v3911_v36 = vor.u32 %v4834_v31, %v3910_v30  ;;  %v3638_v37 = vld [vmem:[%s7432_s1 + $0x440] sm:$0xf]  ;;  %v4798_v41 = vld [vmem:[%s7432_s1 + $0x54c] sm:$0xf0]  ;;  %v3592_v14 = vld [vmem:[%s7432_s1 + $0x3f0] sm:$0xf0] }
  0x32   :  { %1490 = vmatpush.bf16.msrb.mxu2 %v3927_v24  ;;  %v3766_v39 = vld [vmem:[%s7432_s1 + $0x540] sm:$0xf]  ;;  %v4830_v43 = vld [vmem:[%s7432_s1 + $0x64c] sm:$0xf0]  ;;  %v3639_v46 = vor.u32 %v4766_v38, %v3638_v37  ;;  %v4784_v21 = vld [vmem:[%s7432_s1 + $0x4e4] sm:$0xf]  ;;  %v3595_v29 = vor.u32 %v4752_v13, %v3592_v14  ;;  %v5504_v37 = vpack.c.b16 %v274_v15, %v274_v15 }
  0x33   :  { %1503 = vmatpush.bf16.msrb.mxu3 %v3163_v28  ;;  %v3894_v42 = vld [vmem:[%s7432_s1 + $0x640] sm:$0xf]  ;;  %v3767_v47 = vor.u32 %v4798_v41, %v3766_v39  ;;  %v4762_v50 = vld [vmem:[%s7432_s1 + $0x42c] sm:$0xf0]  ;;  %v3720_v23 = vld [vmem:[%s7432_s1 + $0x4f0] sm:$0xf0]  ;;  %v3467_v28 = vor.u32 %v4720_v10, %v3464_v12 }
  0x34   :  { %1465 = vmatpush.bf16.msrb.mxu0 %v3655_v34  ;;  %v3895_v48 = vor.u32 %v4830_v43, %v3894_v42  ;;  %v3622_v49 = vld [vmem:[%s7432_s1 + $0x420] sm:$0xf]  ;;  %v4794_v53 = vld [vmem:[%s7432_s1 + $0x52c] sm:$0xf0]  ;;  %v4684_v30 = vld [vmem:[%s7432_s1 + $0x1c4] sm:$0xf]  ;;  %v3723_v33 = vor.u32 %v4784_v21, %v3720_v23 }
  0x35   :  { %1478 = vmatpush.bf16.msrb.mxu1 %v3783_v35  ;;  %v3750_v51 = vld [vmem:[%s7432_s1 + $0x520] sm:$0xf]  ;;  %v4826_v55 = vld [vmem:[%s7432_s1 + $0x62c] sm:$0xf0]  ;;  %v3623_v59 = vor.u32 %v4762_v50, %v3622_v49  ;;  %v3320_v31 = vld [vmem:[%s7432_s1 + $0x1d0] sm:$0xf0] }
  0x36   :  { %1491 = vmatpush.bf16.msrb.mxu2 %v3911_v36  ;;  %v3878_v54 = vld [vmem:[%s7432_s1 + $0x620] sm:$0xf]  ;;  %v4758_v60 = vld [vmem:[%s7432_s1 + $0x40c] sm:$0xf0]  ;;  %v3751_v63 = vor.u32 %v4794_v53, %v3750_v51  ;;  %v3448_v34 = vld [vmem:[%s7432_s1 + $0x2d0] sm:$0xf0]  ;;  %v3323_v42 = vor.u32 %v4684_v30, %v3320_v31 }
  0x37   :  { %1504 = vmatpush.bf16.msrb.mxu3 %v3147_v40  ;;  %v3606_v58 = vld [vmem:[%s7432_s1 + $0x400] sm:$0xf]  ;;  %v4790_v62 = vld [vmem:[%s7432_s1 + $0x50c] sm:$0xf0]  ;;  %v3879_v0 = vor.u32 %v4826_v55, %v3878_v54  ;;  %v4748_v35 = vld [vmem:[%s7432_s1 + $0x3c4] sm:$0xf]  ;;  %v3451_v43 = vor.u32 %v4716_v32, %v3448_v34 }
  0x38   :  { %1466 = vmatpush.bf16.msrb.mxu0 %v3639_v46  ;;  %v3734_v61 = vld [vmem:[%s7432_s1 + $0x500] sm:$0xf]  ;;  %v4822_v2 = vld [vmem:[%s7432_s1 + $0x60c] sm:$0xf0]  ;;  %v3607_v11 = vor.u32 %v4758_v60, %v3606_v58  ;;  %v3576_v36 = vld [vmem:[%s7432_s1 + $0x3d0] sm:$0xf0] }
  0x39   :  { %1479 = vmatpush.bf16.msrb.mxu1 %v3767_v47  ;;  %v3862_v1 = vld [vmem:[%s7432_s1 + $0x600] sm:$0xf]  ;;  %v28_v7 = vld [vmem:[%s7433_s0 + $0x10] sm:$0xff]  ;;  %v3735_v16 = vor.u32 %v4790_v62, %v3734_v61  ;;  %v4780_v38 = vld [vmem:[%s7432_s1 + $0x4c4] sm:$0xf]  ;;  %v3579_v44 = vor.u32 %v4748_v35, %v3576_v36 }
  0x3a   :  { %1492 = vmatpush.bf16.msrb.mxu2 %v3895_v48  ;;  %v3863_v17 = vor.u32 %v4822_v2, %v3862_v1  ;;  %v272_v24 = vunpack.c.l.b16 %v28_v7  ;;  %v273_v25 = vunpack.c.h.b16 %v28_v7  ;;  %v3704_v39 = vld [vmem:[%s7432_s1 + $0x4d0] sm:$0xf0]  ;;  %v4680_v45 = vld [vmem:[%s7432_s1 + $0x1a4] sm:$0xf] }
  0x3b   :  { %1505 = vmatpush.bf16.msrb.mxu3 %v3131_v52  ;;  %v3304_v46 = vld [vmem:[%s7432_s1 + $0x1b0] sm:$0xf0]  ;;  %v4712_v47 = vld [vmem:[%s7432_s1 + $0x2a4] sm:$0xf]  ;;  %v3707_v48 = vor.u32 %v4780_v38, %v3704_v39 }
  0x3c   :  { %1467 = vmatpush.bf16.msrb.mxu0 %v3623_v59  ;;  %v5512_v40 = vpack.c.b16 %v272_v24, %v272_v24  ;;  %v5514_v41 = vpack.c.b16 %v273_v25, %v273_v25  ;;  %v3432_v49 = vld [vmem:[%s7432_s1 + $0x2b0] sm:$0xf0]  ;;  %v4744_v50 = vld [vmem:[%s7432_s1 + $0x3a4] sm:$0xf]  ;;  %v3307_v54 = vor.u32 %v4680_v45, %v3304_v46 }
  0x3d   :  { %1480 = vmatpush.bf16.msrb.mxu1 %v3751_v63  ;;  %v3560_v51 = vld [vmem:[%s7432_s1 + $0x3b0] sm:$0xf0]  ;;  %v4776_v52 = vld [vmem:[%s7432_s1 + $0x4a4] sm:$0xf]  ;;  %v3435_v55 = vor.u32 %v4712_v47, %v3432_v49 }
  0x3e   :  { %1493 = vmatpush.bf16.msrb.mxu2 %v3879_v0  ;;  %v3688_v53 = vld [vmem:[%s7432_s1 + $0x4b0] sm:$0xf0]  ;;  %v3563_v56 = vor.u32 %v4744_v50, %v3560_v51  ;;  %v4676_v57 = vld [vmem:[%s7432_s1 + $0x184] sm:$0xf] }
  0x3f   :  { %1506 = vmatpush.bf16.msrb.mxu3 %v3115_v4  ;;  %v3288_v58 = vld [vmem:[%s7432_s1 + $0x190] sm:$0xf0]  ;;  %v4708_v59 = vld [vmem:[%s7432_s1 + $0x284] sm:$0xf]  ;;  %v3691_v60 = vor.u32 %v4776_v52, %v3688_v53 }
  0x40   :  { %1468 = vmatpush.bf16.msrb.mxu0 %v3607_v11  ;;  %v3416_v61 = vld [vmem:[%s7432_s1 + $0x290] sm:$0xf0]  ;;  %v4740_v62 = vld [vmem:[%s7432_s1 + $0x384] sm:$0xf]  ;;  %v3291_v2 = vor.u32 %v4676_v57, %v3288_v58 }
  0x41   :  { %1481 = vmatpush.bf16.msrb.mxu1 %v3735_v16  ;;  %v3544_v63 = vld [vmem:[%s7432_s1 + $0x390] sm:$0xf0]  ;;  %v4772_v0 = vld [vmem:[%s7432_s1 + $0x484] sm:$0xf]  ;;  %v3419_v3 = vor.u32 %v4708_v59, %v3416_v61 }
  0x42   :  { %1494 = vmatpush.bf16.msrb.mxu2 %v3863_v17  ;;  %v3672_v1 = vld [vmem:[%s7432_s1 + $0x490] sm:$0xf0]  ;;  %v3547_v4 = vor.u32 %v4740_v62, %v3544_v63  ;;  %v4672_v5 = vld [vmem:[%s7432_s1 + $0x164] sm:$0xf]  ;;  %v3214_v62 = vld [vmem:[%s7432_s1 + $0xe8] sm:$0xf] }
  0x43   :  { %1507 = vmatpush.bf16.msrb.mxu3 %v3099_v26  ;;  %1469 = vmatmul.bf16.vlgmr.msrb.gmra.mxu0 %v5512_v40  ;;  %v3272_v6 = vld [vmem:[%s7432_s1 + $0x170] sm:$0xf0]  ;;  %v4704_v7 = vld [vmem:[%s7432_s1 + $0x264] sm:$0xf]  ;;  %v3675_v8 = vor.u32 %v4772_v0, %v3672_v1  ;;  %v4659_v63 = vld [vmem:[%s7432_s1 + $0xf4] sm:$0xf0] }
  0x44   :  { %1513 = vmatpush.bf16.msra.mxu0 %v3339_v27  ;;  %1482 = vmatmul.bf16.vlgmr.msrb.gmra.mxu1 %v5514_v41  ;;  %v3400_v9 = vld [vmem:[%s7432_s1 + $0x270] sm:$0xf0]  ;;  %v4736_v10 = vld [vmem:[%s7432_s1 + $0x364] sm:$0xf]  ;;  %v3275_v14 = vor.u32 %v4672_v5, %v3272_v6 }
  0x45   :  { %1526 = vmatpush.bf16.msra.mxu1 %v3467_v28  ;;  %1495 = vmatmul.bf16.vlgmr.msrb.gmra.mxu2 %v5504_v37  ;;  %v3528_v11 = vld [vmem:[%s7432_s1 + $0x370] sm:$0xf0]  ;;  %v4768_v12 = vld [vmem:[%s7432_s1 + $0x464] sm:$0xf]  ;;  %v3403_v15 = vor.u32 %v4704_v7, %v3400_v9  ;;  %v3215_v7 = vor.u32 %v4659_v63, %v3214_v62 }
  0x46   :  { %1539 = vmatpush.bf16.msra.mxu2 %v3595_v29  ;;  %1508 = vmatmul.bf16.vlgmr.msrb.gmra.mxu3 %v5350_v19  ;;  %v3656_v13 = vld [vmem:[%s7432_s1 + $0x470] sm:$0xf0]  ;;  %v3531_v16 = vor.u32 %v4736_v10, %v3528_v11  ;;  %v4668_v17 = vld [vmem:[%s7432_s1 + $0x144] sm:$0xf] }
  0x47   :  { %1552 = vmatpush.bf16.msra.mxu3 %v3723_v33  ;;  %v3256_v21 = vld [vmem:[%s7432_s1 + $0x150] sm:$0xf0]  ;;  %v4700_v23 = vld [vmem:[%s7432_s1 + $0x244] sm:$0xf]  ;;  %v3659_v24 = vor.u32 %v4768_v12, %v3656_v13  ;;  %v3198_v13 = vld [vmem:[%s7432_s1 + $0xc8] sm:$0xf] }
  0x48   :  { %1514 = vmatpush.bf16.msra.mxu0 %v3323_v42  ;;  %v3384_v25 = vld [vmem:[%s7432_s1 + $0x250] sm:$0xf0]  ;;  %v4732_v26 = vld [vmem:[%s7432_s1 + $0x344] sm:$0xf]  ;;  %v3259_v30 = vor.u32 %v4668_v17, %v3256_v21 }
  0x49   :  { %1527 = vmatpush.bf16.msra.mxu1 %v3451_v43  ;;  %v3512_v27 = vld [vmem:[%s7432_s1 + $0x350] sm:$0xf0]  ;;  %v4764_v28 = vld [vmem:[%s7432_s1 + $0x444] sm:$0xf]  ;;  %v3387_v31 = vor.u32 %v4700_v23, %v3384_v25 }
  0x4a   :  { %1540 = vmatpush.bf16.msra.mxu2 %v3579_v44  ;;  %v3640_v29 = vld [vmem:[%s7432_s1 + $0x450] sm:$0xf0]  ;;  %v3515_v32 = vor.u32 %v4732_v26, %v3512_v27  ;;  %v4664_v33 = vld [vmem:[%s7432_s1 + $0x124] sm:$0xf] }
  0x4b   :  { %1553 = vmatpush.bf16.msra.mxu3 %v3707_v48  ;;  %v3240_v34 = vld [vmem:[%s7432_s1 + $0x130] sm:$0xf0]  ;;  %v4696_v35 = vld [vmem:[%s7432_s1 + $0x224] sm:$0xf]  ;;  %v3643_v36 = vor.u32 %v4764_v28, %v3640_v29  ;;  %v3182_v29 = vld [vmem:[%s7432_s1 + $0xa8] sm:$0xf] }
  0x4c   :  { %1515 = vmatpush.bf16.msra.mxu0 %v3307_v54  ;;  %v3368_v38 = vld [vmem:[%s7432_s1 + $0x230] sm:$0xf0]  ;;  %v4728_v39 = vld [vmem:[%s7432_s1 + $0x324] sm:$0xf]  ;;  %v3243_v45 = vor.u32 %v4664_v33, %v3240_v34 }
  0x4d   :  { %1528 = vmatpush.bf16.msra.mxu1 %v3435_v55  ;;  %v3496_v42 = vld [vmem:[%s7432_s1 + $0x330] sm:$0xf0]  ;;  %v4760_v43 = vld [vmem:[%s7432_s1 + $0x424] sm:$0xf]  ;;  %v3371_v48 = vor.u32 %v4696_v35, %v3368_v38 }
  0x4e   :  { %1541 = vmatpush.bf16.msra.mxu2 %v3563_v56  ;;  %v3624_v44 = vld [vmem:[%s7432_s1 + $0x430] sm:$0xf0]  ;;  %v4660_v46 = vld [vmem:[%s7432_s1 + $0x104] sm:$0xf]  ;;  %v3499_v49 = vor.u32 %v4728_v39, %v3496_v42 }
  0x4f   :  { %1554 = vmatpush.bf16.msra.mxu3 %v3691_v60  ;;  %v3224_v47 = vld [vmem:[%s7432_s1 + $0x110] sm:$0xf0]  ;;  %v4692_v50 = vld [vmem:[%s7432_s1 + $0x204] sm:$0xf]  ;;  %v3627_v53 = vor.u32 %v4760_v43, %v3624_v44  ;;  %v3166_v44 = vld [vmem:[%s7432_s1 + $0x88] sm:$0xf] }
  0x50   :  { %1516 = vmatpush.bf16.msra.mxu0 %v3291_v2  ;;  %v3352_v51 = vld [vmem:[%s7432_s1 + $0x210] sm:$0xf0]  ;;  %v4724_v52 = vld [vmem:[%s7432_s1 + $0x304] sm:$0xf]  ;;  %v3227_v60 = vor.u32 %v4660_v46, %v3224_v47  ;;  %v3342_v2 = vld [vmem:[%s7432_s1 + $0x1e8] sm:$0xf] }
  0x51   :  { %1529 = vmatpush.bf16.msra.mxu1 %v3419_v3  ;;  %v3480_v54 = vld [vmem:[%s7432_s1 + $0x310] sm:$0xf0]  ;;  %v4756_v55 = vld [vmem:[%s7432_s1 + $0x404] sm:$0xf]  ;;  %v3355_v0 = vor.u32 %v4692_v50, %v3352_v51  ;;  %v4691_v3 = vld [vmem:[%s7432_s1 + $0x1f4] sm:$0xf0] }
  0x52   :  { %1542 = vmatpush.bf16.msra.mxu2 %v3547_v4  ;;  %v3608_v56 = vld [vmem:[%s7432_s1 + $0x410] sm:$0xf0]  ;;  %v4816_v57 = vld [vmem:[%s7432_s1 + $0x5e4] sm:$0xf]  ;;  %v3483_v1 = vor.u32 %v4724_v52, %v3480_v54  ;;  %v3343_v11 = vor.u32 %v4691_v3, %v3342_v2  ;;  %v3294_v46 = vld [vmem:[%s7432_s1 + $0x188] sm:$0xf] }
  0x53   :  { %1555 = vmatpush.bf16.msra.mxu3 %v3675_v8  ;;  %v3848_v58 = vld [vmem:[%s7432_s1 + $0x5f0] sm:$0xf0]  ;;  %v4848_v59 = vld [vmem:[%s7432_s1 + $0x6e4] sm:$0xf]  ;;  %v3611_v4 = vor.u32 %v4756_v55, %v3608_v56  ;;  %v4679_v47 = vld [vmem:[%s7432_s1 + $0x194] sm:$0xf0] }
  0x54   :  { %1517 = vmatpush.bf16.msra.mxu0 %v3275_v14  ;;  %v3976_v61 = vld [vmem:[%s7432_s1 + $0x6f0] sm:$0xf0]  ;;  %v3851_v5 = vor.u32 %v4816_v57, %v3848_v58  ;;  %v4812_v8 = vld [vmem:[%s7432_s1 + $0x5c4] sm:$0xf]  ;;  %v4655_v14 = vld [vmem:[%s7432_s1 + $0xd4] sm:$0xf0]  ;;  %v3295_v54 = vor.u32 %v4679_v47, %v3294_v46 }
  0x55   :  { %1530 = vmatpush.bf16.msra.mxu1 %v3403_v15  ;;  %v3979_v6 = vor.u32 %v4848_v59, %v3976_v61  ;;  %v3832_v9 = vld [vmem:[%s7432_s1 + $0x5d0] sm:$0xf0]  ;;  %v4844_v10 = vld [vmem:[%s7432_s1 + $0x6c4] sm:$0xf]  ;;  %v3326_v15 = vld [vmem:[%s7432_s1 + $0x1c8] sm:$0xf]  ;;  %v3199_v23 = vor.u32 %v4655_v14, %v3198_v13 }
  0x56   :  { %1543 = vmatpush.bf16.msra.mxu2 %v3531_v16  ;;  %v3960_v12 = vld [vmem:[%s7432_s1 + $0x6d0] sm:$0xf0]  ;;  %v4687_v16 = vld [vmem:[%s7432_s1 + $0x1d4] sm:$0xf0]  ;;  %v3835_v17 = vor.u32 %v4812_v8, %v3832_v9  ;;  %v4840_v26 = vld [vmem:[%s7432_s1 + $0x6a4] sm:$0xf] }
  0x57   :  { %1556 = vmatpush.bf16.msra.mxu3 %v3659_v24  ;;  %v3963_v21 = vor.u32 %v4844_v10, %v3960_v12  ;;  %v4808_v24 = vld [vmem:[%s7432_s1 + $0x5a4] sm:$0xf]  ;;  %v3816_v25 = vld [vmem:[%s7432_s1 + $0x5b0] sm:$0xf0]  ;;  %v3327_v27 = vor.u32 %v4687_v16, %v3326_v15  ;;  %v3150_v56 = vld [vmem:[%s7432_s1 + $0x68] sm:$0xf] }
  0x58   :  { %1518 = vmatpush.bf16.msra.mxu0 %v3259_v30  ;;  %v3944_v28 = vld [vmem:[%s7432_s1 + $0x6b0] sm:$0xf0]  ;;  %v4651_v30 = vld [vmem:[%s7432_s1 + $0xb4] sm:$0xf0]  ;;  %v3819_v33 = vor.u32 %v4808_v24, %v3816_v25  ;;  %v4836_v39 = vld [vmem:[%s7432_s1 + $0x684] sm:$0xf] }
  0x59   :  { %1531 = vmatpush.bf16.msra.mxu1 %v3387_v31  ;;  %v3310_v31 = vld [vmem:[%s7432_s1 + $0x1a8] sm:$0xf]  ;;  %v3947_v34 = vor.u32 %v4840_v26, %v3944_v28  ;;  %v3183_v35 = vor.u32 %v4651_v30, %v3182_v29  ;;  %v3800_v38 = vld [vmem:[%s7432_s1 + $0x590] sm:$0xf0]  ;;  %v4800_v51 = vld [vmem:[%s7432_s1 + $0x564] sm:$0xf] }
  0x5a   :  { %1544 = vmatpush.bf16.msra.mxu2 %v3515_v32  ;;  %v4683_v32 = vld [vmem:[%s7432_s1 + $0x1b4] sm:$0xf0]  ;;  %v3928_v43 = vld [vmem:[%s7432_s1 + $0x690] sm:$0xf0]  ;;  %v3278_v58 = vld [vmem:[%s7432_s1 + $0x168] sm:$0xf] }
  0x5b   :  { %1557 = vmatpush.bf16.msra.mxu3 %v3643_v36  ;;  %v4804_v36 = vld [vmem:[%s7432_s1 + $0x584] sm:$0xf]  ;;  %v3311_v42 = vor.u32 %v4683_v32, %v3310_v31  ;;  %v3784_v52 = vld [vmem:[%s7432_s1 + $0x570] sm:$0xf0]  ;;  %v4643_v57 = vld [vmem:[%s7432_s1 + $0x74] sm:$0xf0] }
  0x5c   :  { %1519 = vmatpush.bf16.msra.mxu0 %v3243_v45  ;;  %v4647_v45 = vld [vmem:[%s7432_s1 + $0x94] sm:$0xf0]  ;;  %v3912_v55 = vld [vmem:[%s7432_s1 + $0x670] sm:$0xf0]  ;;  %v3151_v62 = vor.u32 %v4643_v57, %v3150_v56  ;;  %v4796_v63 = vld [vmem:[%s7432_s1 + $0x544] sm:$0xf] }
  0x5d   :  { %1532 = vmatpush.bf16.msra.mxu1 %v3371_v48  ;;  %v3803_v48 = vor.u32 %v4804_v36, %v3800_v38  ;;  %v3167_v50 = vor.u32 %v4647_v45, %v3166_v44  ;;  %v4675_v59 = vld [vmem:[%s7432_s1 + $0x174] sm:$0xf0]  ;;  %v3896_v3 = vld [vmem:[%s7432_s1 + $0x650] sm:$0xf0]  ;;  %v4824_v13 = vld [vmem:[%s7432_s1 + $0x624] sm:$0xf] }
  0x5e   :  { %1545 = vmatpush.bf16.msra.mxu2 %v3499_v49  ;;  %v3931_v49 = vor.u32 %v4836_v39, %v3928_v43  ;;  %v3279_v2 = vor.u32 %v4675_v59, %v3278_v58  ;;  %v3752_v12 = vld [vmem:[%s7432_s1 + $0x530] sm:$0xf0]  ;;  %v3118_v16 = vld [vmem:[%s7432_s1 + $0x28] sm:$0xf]  ;;  %v4788_v25 = vld [vmem:[%s7432_s1 + $0x504] sm:$0xf] }
  0x5f   :  { %1558 = vmatpush.bf16.msra.mxu3 %v3627_v53  ;;  %v4832_v53 = vld [vmem:[%s7432_s1 + $0x664] sm:$0xf]  ;;  %v3880_v15 = vld [vmem:[%s7432_s1 + $0x630] sm:$0xf0]  ;;  %v3102_v31 = vld [vmem:[%s7432_s1 + $0x8] sm:$0xf] }
  0x60   :  { %1520 = vmatpush.bf16.msra.mxu0 %v3227_v60  ;;  %v3787_v60 = vor.u32 %v4800_v51, %v3784_v52  ;;  %v3915_v61 = vor.u32 %v4832_v53, %v3912_v55  ;;  %v3736_v26 = vld [vmem:[%s7432_s1 + $0x510] sm:$0xf0]  ;;  %v4820_v29 = vld [vmem:[%s7432_s1 + $0x604] sm:$0xf]  ;;  %v3470_v36 = vld [vmem:[%s7432_s1 + $0x2e8] sm:$0xf] }
  0x61   :  { %1533 = vmatpush.bf16.msra.mxu1 %v3355_v0  ;;  %v3768_v0 = vld [vmem:[%s7432_s1 + $0x550] sm:$0xf0]  ;;  %v4723_v38 = vld [vmem:[%s7432_s1 + $0x2f4] sm:$0xf0]  ;;  %v3598_v39 = vld [vmem:[%s7432_s1 + $0x3e8] sm:$0xf] }
  0x62   :  { %1546 = vmatpush.bf16.msra.mxu2 %v3483_v1  ;;  %v4828_v1 = vld [vmem:[%s7432_s1 + $0x644] sm:$0xf]  ;;  %v3771_v8 = vor.u32 %v4796_v63, %v3768_v0  ;;  %v3864_v30 = vld [vmem:[%s7432_s1 + $0x610] sm:$0xf0]  ;;  %v4755_v43 = vld [vmem:[%s7432_s1 + $0x3f4] sm:$0xf0]  ;;  %v3471_v51 = vor.u32 %v4723_v38, %v3470_v36 }
  0x63   :  { %1559 = vmatpush.bf16.msra.mxu3 %v3611_v4  ;;  %1521 = vmatmul.bf16.vlgmr.msra.gmra.mxu0 %v5354_v22  ;;  %v3134_v4 = vld [vmem:[%s7432_s1 + $0x48] sm:$0xf]  ;;  %v3899_v9 = vor.u32 %v4828_v1, %v3896_v3  ;;  %v4787_v45 = vld [vmem:[%s7432_s1 + $0x4f4] sm:$0xf0]  ;;  %v3867_v46 = vor.u32 %v4820_v29, %v3864_v30  ;;  %v3599_v52 = vor.u32 %v4755_v43, %v3598_v39 }
  0x64   :  { %1565 = vmatpush.bf16.msrb.mxu0 %v3851_v5  ;;  %1534 = vmatmul.bf16.vlgmr.msra.gmra.mxu1 %v5348_v18  ;;  %v4639_v5 = vld [vmem:[%s7432_s1 + $0x54] sm:$0xf0]  ;;  %v3726_v44 = vld [vmem:[%s7432_s1 + $0x4e8] sm:$0xf] }
  0x65   :  { %1578 = vmatpush.bf16.msrb.mxu1 %v3979_v6  ;;  %1547 = vmatmul.bf16.vlgmr.msra.gmra.mxu2 %v5352_v20  ;;  %v3262_v6 = vld [vmem:[%s7432_s1 + $0x148] sm:$0xf]  ;;  %v3135_v10 = vor.u32 %v4639_v5, %v3134_v4  ;;  %v3727_v53 = vor.u32 %v4787_v45, %v3726_v44  ;;  %v4719_v55 = vld [vmem:[%s7432_s1 + $0x2d4] sm:$0xf0] }
  0x66   :  { %1591 = vmatpush.bf16.msrb.mxu2 %v3215_v7  ;;  %1560 = vmatmul.bf16.vlgmr.msra.gmra.mxu3 %v5512_v40  ;;  %v4671_v7 = vld [vmem:[%s7432_s1 + $0x154] sm:$0xf0]  ;;  %v3582_v56 = vld [vmem:[%s7432_s1 + $0x3c8] sm:$0xf] }
  0x67   :  { %1604 = vmatpush.bf16.msrb.mxu3 %v3343_v11  ;;  %v4792_v11 = vld [vmem:[%s7432_s1 + $0x524] sm:$0xf]  ;;  %v3263_v14 = vor.u32 %v4671_v7, %v3262_v6  ;;  %v4751_v58 = vld [vmem:[%s7432_s1 + $0x3d4] sm:$0xf0]  ;;  %v3710_v59 = vld [vmem:[%s7432_s1 + $0x4c8] sm:$0xf] }
  0x68   :  { %1566 = vmatpush.bf16.msrb.mxu0 %v3835_v17  ;;  %v4635_v17 = vld [vmem:[%s7432_s1 + $0x34] sm:$0xf0]  ;;  %v3755_v24 = vor.u32 %v4792_v11, %v3752_v12  ;;  %v3583_v0 = vor.u32 %v4751_v58, %v3582_v56  ;;  %v3566_v4 = vld [vmem:[%s7432_s1 + $0x3a8] sm:$0xf] }
  0x69   :  { %1579 = vmatpush.bf16.msrb.mxu1 %v3963_v21  ;;  %v3246_v21 = vld [vmem:[%s7432_s1 + $0x128] sm:$0xf]  ;;  %v3119_v28 = vor.u32 %v4635_v17, %v3118_v16  ;;  %v4715_v3 = vld [vmem:[%s7432_s1 + $0x2b4] sm:$0xf0] }
  0x6a   :  { %1592 = vmatpush.bf16.msrb.mxu2 %v3199_v23  ;;  %v4667_v23 = vld [vmem:[%s7432_s1 + $0x134] sm:$0xf0]  ;;  %v3694_v7 = vld [vmem:[%s7432_s1 + $0x4a8] sm:$0xf] }
  0x6b   :  { %1605 = vmatpush.bf16.msrb.mxu3 %v3327_v27  ;;  %v3883_v27 = vor.u32 %v4824_v13, %v3880_v15  ;;  %v3247_v32 = vor.u32 %v4667_v23, %v3246_v21  ;;  %v4747_v6 = vld [vmem:[%s7432_s1 + $0x3b4] sm:$0xf0]  ;;  %v3550_v16 = vld [vmem:[%s7432_s1 + $0x388] sm:$0xf] }
  0x6c   :  { %1567 = vmatpush.bf16.msrb.mxu0 %v3819_v33  ;;  %v4631_v33 = vld [vmem:[%s7432_s1 + $0x14] sm:$0xf0]  ;;  %v3567_v12 = vor.u32 %v4747_v6, %v3566_v4  ;;  %v3678_v23 = vld [vmem:[%s7432_s1 + $0x488] sm:$0xf] }
  0x6d   :  { %1580 = vmatpush.bf16.msrb.mxu1 %v3947_v34  ;;  %v3230_v34 = vld [vmem:[%s7432_s1 + $0x108] sm:$0xf]  ;;  %v3103_v47 = vor.u32 %v4631_v33, %v3102_v31  ;;  %v4711_v15 = vld [vmem:[%s7432_s1 + $0x294] sm:$0xf0] }
  0x6e   :  { %1593 = vmatpush.bf16.msrb.mxu2 %v3183_v35  ;;  %v4663_v35 = vld [vmem:[%s7432_s1 + $0x114] sm:$0xf0]  ;;  %v3406_v30 = vld [vmem:[%s7432_s1 + $0x268] sm:$0xf] }
  0x6f   :  { %1606 = vmatpush.bf16.msrb.mxu3 %v3311_v42  ;;  %v3739_v42 = vor.u32 %v4788_v25, %v3736_v26  ;;  %v4743_v21 = vld [vmem:[%s7432_s1 + $0x394] sm:$0xf0]  ;;  %v3806_v25 = vld [vmem:[%s7432_s1 + $0x588] sm:$0xf] }
  0x70   :  { %1568 = vmatpush.bf16.msrb.mxu0 %v3803_v48  ;;  %v3854_v48 = vld [vmem:[%s7432_s1 + $0x5e8] sm:$0xf]  ;;  %v4807_v26 = vld [vmem:[%s7432_s1 + $0x594] sm:$0xf0] }
  0x71   :  { %1581 = vmatpush.bf16.msrb.mxu1 %v3931_v49  ;;  %v4819_v49 = vld [vmem:[%s7432_s1 + $0x5f4] sm:$0xf0]  ;;  %v3807_v33 = vor.u32 %v4807_v26, %v3806_v25  ;;  %v3790_v38 = vld [vmem:[%s7432_s1 + $0x568] sm:$0xf] }
  0x72   :  { %1594 = vmatpush.bf16.msrb.mxu2 %v3167_v50  ;;  %v3231_v50 = vor.u32 %v4663_v35, %v3230_v34  ;;  %v3855_v57 = vor.u32 %v4819_v49, %v3854_v48  ;;  %v4707_v31 = vld [vmem:[%s7432_s1 + $0x274] sm:$0xf0]  ;;  %v3662_v35 = vld [vmem:[%s7432_s1 + $0x468] sm:$0xf] }
  0x73   :  { %1607 = vmatpush.bf16.msrb.mxu3 %v3295_v54  ;;  %v3454_v54 = vld [vmem:[%s7432_s1 + $0x2c8] sm:$0xf]  ;;  %v4739_v34 = vld [vmem:[%s7432_s1 + $0x374] sm:$0xf0] }
  0x74   :  { %1569 = vmatpush.bf16.msrb.mxu0 %v3787_v60  ;;  %v4783_v60 = vld [vmem:[%s7432_s1 + $0x4d4] sm:$0xf0]  ;;  %v3455_v63 = vor.u32 %v4719_v55, %v3454_v54  ;;  %v3390_v45 = vld [vmem:[%s7432_s1 + $0x248] sm:$0xf] }
  0x75   :  { %1582 = vmatpush.bf16.msrb.mxu1 %v3915_v61  ;;  %v3838_v61 = vld [vmem:[%s7432_s1 + $0x5c8] sm:$0xf]  ;;  %v3711_v1 = vor.u32 %v4783_v60, %v3710_v59  ;;  %v4771_v36 = vld [vmem:[%s7432_s1 + $0x474] sm:$0xf0] }
  0x76   :  { %1595 = vmatpush.bf16.msrb.mxu2 %v3151_v62  ;;  %v4815_v62 = vld [vmem:[%s7432_s1 + $0x5d4] sm:$0xf0]  ;;  %v3663_v44 = vor.u32 %v4771_v36, %v3662_v35  ;;  %v3502_v59 = vld [vmem:[%s7432_s1 + $0x328] sm:$0xf]  ;;  %v4653_v35 = vld [vmem:[%s7432_s1 + $0xcc] sm:$0xf] }
  0x77   :  { %1608 = vmatpush.bf16.msrb.mxu3 %v3279_v2  ;;  %v3438_v2 = vld [vmem:[%s7432_s1 + $0x2a8] sm:$0xf]  ;;  %v3839_v5 = vor.u32 %v4815_v62, %v3838_v61  ;;  %v4803_v39 = vld [vmem:[%s7432_s1 + $0x574] sm:$0xf0] }
  0x78   :  { %1570 = vmatpush.bf16.msrb.mxu0 %v3771_v8  ;;  %v4779_v8 = vld [vmem:[%s7432_s1 + $0x4b4] sm:$0xf0]  ;;  %v3439_v11 = vor.u32 %v4715_v3, %v3438_v2  ;;  %v3791_v48 = vor.u32 %v4803_v39, %v3790_v38  ;;  %v3630_v62 = vld [vmem:[%s7432_s1 + $0x428] sm:$0xf]  ;;  %v3200_v38 = vld [vmem:[%s7432_s1 + $0xd8] sm:$0xf0] }
  0x79   :  { %1583 = vmatpush.bf16.msrb.mxu1 %v3899_v9  ;;  %v3822_v9 = vld [vmem:[%s7432_s1 + $0x5a8] sm:$0xf]  ;;  %v3695_v13 = vor.u32 %v4779_v8, %v3694_v7  ;;  %v4735_v49 = vld [vmem:[%s7432_s1 + $0x354] sm:$0xf0]  ;;  %v4685_v39 = vld [vmem:[%s7432_s1 + $0x1cc] sm:$0xf] }
  0x7a   :  { %1596 = vmatpush.bf16.msrb.mxu2 %v3135_v10  ;;  %v4811_v10 = vld [vmem:[%s7432_s1 + $0x5b4] sm:$0xf0]  ;;  %v3358_v3 = vld [vmem:[%s7432_s1 + $0x208] sm:$0xf] }
  0x7b   :  { %1609 = vmatpush.bf16.msrb.mxu3 %v3263_v14  ;;  %v3422_v14 = vld [vmem:[%s7432_s1 + $0x288] sm:$0xf]  ;;  %v3823_v17 = vor.u32 %v4811_v10, %v3822_v9  ;;  %v4699_v58 = vld [vmem:[%s7432_s1 + $0x234] sm:$0xf0] }
  0x7c   :  { %1571 = vmatpush.bf16.msrb.mxu0 %v3755_v24  ;;  %v4775_v24 = vld [vmem:[%s7432_s1 + $0x494] sm:$0xf0]  ;;  %v3486_v7 = vld [vmem:[%s7432_s1 + $0x308] sm:$0xf] }
  0x7d   :  { %1584 = vmatpush.bf16.msrb.mxu1 %v3883_v27  ;;  %v3423_v27 = vor.u32 %v4711_v15, %v3422_v14  ;;  %v3679_v29 = vor.u32 %v4775_v24, %v3678_v23  ;;  %v4731_v61 = vld [vmem:[%s7432_s1 + $0x334] sm:$0xf0]  ;;  %v3614_v9 = vld [vmem:[%s7432_s1 + $0x408] sm:$0xf]  ;;  %v4689_v23 = vld [vmem:[%s7432_s1 + $0x1ec] sm:$0xf] }
  0x7e   :  { %1597 = vmatpush.bf16.msrb.mxu2 %v3119_v28  ;;  %v3551_v28 = vor.u32 %v4743_v21, %v3550_v16  ;;  %v4695_v4 = vld [vmem:[%s7432_s1 + $0x214] sm:$0xf0]  ;;  %v3982_v14 = vld [vmem:[%s7432_s1 + $0x6e8] sm:$0xf]  ;;  %v4657_v16 = vld [vmem:[%s7432_s1 + $0xec] sm:$0xf] }
  0x7f   :  { %1610 = vmatpush.bf16.msrb.mxu3 %v3247_v32  ;;  %v3534_v32 = vld [vmem:[%s7432_s1 + $0x368] sm:$0xf]  ;;  %v4727_v8 = vld [vmem:[%s7432_s1 + $0x314] sm:$0xf0]  ;;  %v3216_v21 = vld [vmem:[%s7432_s1 + $0xf8] sm:$0xf0] }
  0x80   :  { %1572 = vmatpush.bf16.msrb.mxu0 %v3739_v42  ;;  %v3407_v42 = vor.u32 %v4707_v31, %v3406_v30  ;;  %v3535_v43 = vor.u32 %v4739_v34, %v3534_v32  ;;  %v4851_v15 = vld [vmem:[%s7432_s1 + $0x6f4] sm:$0xf0]  ;;  %v3344_v24 = vld [vmem:[%s7432_s1 + $0x1f8] sm:$0xf0]  ;;  %v3487_v25 = vor.u32 %v4727_v8, %v3486_v7  ;;  %v3219_v31 = vor.u32 %v4657_v16, %v3216_v21  ;;  %v3918_v8 = vld [vmem:[%s7432_s1 + $0x668] sm:$0xf] }
  0x81   :  { %1585 = vmatpush.bf16.msrb.mxu1 %v3867_v46  ;;  %v4703_v46 = vld [vmem:[%s7432_s1 + $0x254] sm:$0xf0]  ;;  %v3983_v30 = vor.u32 %v4851_v15, %v3982_v14  ;;  %v3347_v32 = vor.u32 %v4689_v23, %v3344_v24  ;;  %v3280_v14 = vld [vmem:[%s7432_s1 + $0x178] sm:$0xf0]  ;;  %v4705_v15 = vld [vmem:[%s7432_s1 + $0x26c] sm:$0xf] }
  0x82   :  { %1598 = vmatpush.bf16.msrb.mxu2 %v3103_v47  ;;  %v3518_v47 = vld [vmem:[%s7432_s1 + $0x348] sm:$0xf]  ;;  %v3391_v54 = vor.u32 %v4703_v46, %v3390_v45  ;;  %v4847_v34 = vld [vmem:[%s7432_s1 + $0x6d4] sm:$0xf0]  ;;  %v3203_v46 = vor.u32 %v4653_v35, %v3200_v38  ;;  %v3408_v16 = vld [vmem:[%s7432_s1 + $0x278] sm:$0xf0] }
  0x83   :  { %1611 = vmatpush.bf16.msrb.mxu3 %v3231_v50  ;;  %1573 = vmatmul.bf16.vlgmr.msrb.gmra.mxu0 %v5514_v41  ;;  %v3646_v50 = vld [vmem:[%s7432_s1 + $0x448] sm:$0xf]  ;;  %v3519_v55 = vor.u32 %v4735_v49, %v3518_v47  ;;  %v4843_v49 = vld [vmem:[%s7432_s1 + $0x6b4] sm:$0xf0] }
  0x84   :  { %1617 = vmatpush.bf16.msra.mxu0 %v3471_v51  ;;  %1586 = vmatmul.bf16.vlgmr.msrb.gmra.mxu1 %v5504_v37  ;;  %v4767_v51 = vld [vmem:[%s7432_s1 + $0x454] sm:$0xf0]  ;;  %v3902_v24 = vld [vmem:[%s7432_s1 + $0x648] sm:$0xf] }
  0x85   :  { %1630 = vmatpush.bf16.msra.mxu1 %v3599_v52  ;;  %1599 = vmatmul.bf16.vlgmr.msrb.gmra.mxu2 %v5350_v19  ;;  %v3774_v52 = vld [vmem:[%s7432_s1 + $0x548] sm:$0xf]  ;;  %v3647_v56 = vor.u32 %v4767_v51, %v3646_v50  ;;  %v4649_v50 = vld [vmem:[%s7432_s1 + $0xac] sm:$0xf] }
  0x86   :  { %1643 = vmatpush.bf16.msra.mxu2 %v3727_v53  ;;  %1612 = vmatmul.bf16.vlgmr.msrb.gmra.mxu3 %v5354_v22  ;;  %v4799_v53 = vld [vmem:[%s7432_s1 + $0x554] sm:$0xf0]  ;;  %v3886_v38 = vld [vmem:[%s7432_s1 + $0x628] sm:$0xf] }
  0x87   :  { %1656 = vmatpush.bf16.msra.mxu3 %v3855_v57  ;;  %v3374_v57 = vld [vmem:[%s7432_s1 + $0x228] sm:$0xf]  ;;  %v3775_v60 = vor.u32 %v4799_v53, %v3774_v52  ;;  %v3184_v52 = vld [vmem:[%s7432_s1 + $0xb8] sm:$0xf0]  ;;  %v4681_v53 = vld [vmem:[%s7432_s1 + $0x1ac] sm:$0xf] }
  0x88   :  { %1618 = vmatpush.bf16.msra.mxu0 %v3455_v63  ;;  %v4763_v63 = vld [vmem:[%s7432_s1 + $0x434] sm:$0xf0]  ;;  %v3375_v2 = vor.u32 %v4699_v58, %v3374_v57  ;;  %v3187_v58 = vor.u32 %v4649_v50, %v3184_v52 }
  0x89   :  { %1631 = vmatpush.bf16.msra.mxu1 %v3583_v0  ;;  %v3758_v0 = vld [vmem:[%s7432_s1 + $0x528] sm:$0xf]  ;;  %v3631_v6 = vor.u32 %v4763_v63, %v3630_v62  ;;  %v4645_v62 = vld [vmem:[%s7432_s1 + $0x8c] sm:$0xf]  ;;  %v4823_v52 = vld [vmem:[%s7432_s1 + $0x614] sm:$0xf0] }
  0x8a   :  { %1644 = vmatpush.bf16.msra.mxu2 %v3711_v1  ;;  %v4795_v1 = vld [vmem:[%s7432_s1 + $0x534] sm:$0xf0] }
  0x8b   :  { %1657 = vmatpush.bf16.msra.mxu3 %v3839_v5  ;;  %v3503_v5 = vor.u32 %v4731_v61, %v3502_v59  ;;  %v3759_v10 = vor.u32 %v4795_v1, %v3758_v0  ;;  %v4839_v61 = vld [vmem:[%s7432_s1 + $0x694] sm:$0xf0]  ;;  %v3168_v0 = vld [vmem:[%s7432_s1 + $0x98] sm:$0xf0]  ;;  %v4677_v1 = vld [vmem:[%s7432_s1 + $0x18c] sm:$0xf] }
  0x8c   :  { %1619 = vmatpush.bf16.msra.mxu0 %v3439_v11  ;;  %v4759_v11 = vld [vmem:[%s7432_s1 + $0x414] sm:$0xf0] }
  0x8d   :  { %1632 = vmatpush.bf16.msra.mxu1 %v3567_v12  ;;  %v3742_v12 = vld [vmem:[%s7432_s1 + $0x508] sm:$0xf]  ;;  %v3615_v26 = vor.u32 %v4759_v11, %v3614_v9  ;;  %v4835_v9 = vld [vmem:[%s7432_s1 + $0x674] sm:$0xf0] }
  0x8e   :  { %1645 = vmatpush.bf16.msra.mxu2 %v3695_v13  ;;  %v4791_v13 = vld [vmem:[%s7432_s1 + $0x514] sm:$0xf0] }
  0x8f   :  { %1658 = vmatpush.bf16.msra.mxu3 %v3823_v17  ;;  %v3359_v17 = vor.u32 %v4695_v4, %v3358_v3  ;;  %v4709_v3 = vld [vmem:[%s7432_s1 + $0x28c] sm:$0xf]  ;;  %v3424_v4 = vld [vmem:[%s7432_s1 + $0x298] sm:$0xf0] }
  0x90   :  { %1620 = vmatpush.bf16.msra.mxu0 %v3423_v27  ;;  %v4721_v27 = vld [vmem:[%s7432_s1 + $0x2ec] sm:$0xf]  ;;  %v3427_v11 = vor.u32 %v4709_v3, %v3424_v4  ;;  %v3728_v4 = vld [vmem:[%s7432_s1 + $0x4f8] sm:$0xf0] }
  0x91   :  { %1633 = vmatpush.bf16.msra.mxu1 %v3551_v28  ;;  %v3472_v28 = vld [vmem:[%s7432_s1 + $0x2f8] sm:$0xf0] }
  0x92   :  { %1646 = vmatpush.bf16.msra.mxu2 %v3679_v29  ;;  %v3743_v29 = vor.u32 %v4791_v13, %v3742_v12  ;;  %v3475_v36 = vor.u32 %v4721_v27, %v3472_v28  ;;  %v3152_v12 = vld [vmem:[%s7432_s1 + $0x78] sm:$0xf0]  ;;  %v4673_v13 = vld [vmem:[%s7432_s1 + $0x16c] sm:$0xf]  ;;  %v3411_v27 = vor.u32 %v4705_v15, %v3408_v16 }
  0x93   :  { %1659 = vmatpush.bf16.msra.mxu3 %v3807_v33  ;;  %v3966_v33 = vld [vmem:[%s7432_s1 + $0x6c8] sm:$0xf]  ;;  %v3283_v23 = vor.u32 %v4673_v13, %v3280_v14  ;;  %v3136_v28 = vld [vmem:[%s7432_s1 + $0x58] sm:$0xf0] }
  0x94   :  { %1621 = vmatpush.bf16.msra.mxu0 %v3407_v42  ;;  %v3328_v42 = vld [vmem:[%s7432_s1 + $0x1d8] sm:$0xf0]  ;;  %v3967_v45 = vor.u32 %v4847_v34, %v3966_v33 }
  0x95   :  { %1634 = vmatpush.bf16.msra.mxu1 %v3535_v43  ;;  %v4717_v43 = vld [vmem:[%s7432_s1 + $0x2cc] sm:$0xf]  ;;  %v3331_v47 = vor.u32 %v4685_v39, %v3328_v42  ;;  %v4827_v39 = vld [vmem:[%s7432_s1 + $0x634] sm:$0xf0] }
  0x96   :  { %1647 = vmatpush.bf16.msra.mxu2 %v3663_v44  ;;  %v3456_v44 = vld [vmem:[%s7432_s1 + $0x2d8] sm:$0xf0]  ;;  %v4633_v42 = vld [vmem:[%s7432_s1 + $0x2c] sm:$0xf]  ;;  %v3887_v50 = vor.u32 %v4827_v39, %v3886_v38 }
  0x97   :  { %1660 = vmatpush.bf16.msra.mxu3 %v3791_v48  ;;  %v3950_v48 = vld [vmem:[%s7432_s1 + $0x6a8] sm:$0xf]  ;;  %v3459_v51 = vor.u32 %v4717_v43, %v3456_v44  ;;  %v3568_v38 = vld [vmem:[%s7432_s1 + $0x3b8] sm:$0xf0]  ;;  %v4777_v39 = vld [vmem:[%s7432_s1 + $0x4ac] sm:$0xf] }
  0x98   :  { %1622 = vmatpush.bf16.msra.mxu0 %v3391_v54  ;;  %v3312_v54 = vld [vmem:[%s7432_s1 + $0x1b8] sm:$0xf0]  ;;  %v3951_v57 = vor.u32 %v4843_v49, %v3950_v48  ;;  %v4697_v48 = vld [vmem:[%s7432_s1 + $0x22c] sm:$0xf] }
  0x99   :  { %1635 = vmatpush.bf16.msra.mxu1 %v3519_v55  ;;  %v4713_v55 = vld [vmem:[%s7432_s1 + $0x2ac] sm:$0xf]  ;;  %v3315_v59 = vor.u32 %v4681_v53, %v3312_v54  ;;  %v3376_v49 = vld [vmem:[%s7432_s1 + $0x238] sm:$0xf0] }
  0x9a   :  { %1648 = vmatpush.bf16.msra.mxu2 %v3647_v56  ;;  %v3440_v56 = vld [vmem:[%s7432_s1 + $0x2b8] sm:$0xf0] }
  0x9b   :  { %1661 = vmatpush.bf16.msra.mxu3 %v3775_v60  ;;  %v3934_v60 = vld [vmem:[%s7432_s1 + $0x688] sm:$0xf]  ;;  %v3443_v63 = vor.u32 %v4713_v55, %v3440_v56  ;;  %v4629_v55 = vld [vmem:[%s7432_s1 + $0xc] sm:$0xf]  ;;  %v3104_v56 = vld [vmem:[%s7432_s1 + $0x18] sm:$0xf0] }
  0x9c   :  { %1623 = vmatpush.bf16.msra.mxu0 %v3375_v2  ;;  %v3296_v2 = vld [vmem:[%s7432_s1 + $0x198] sm:$0xf0] }
  0x9d   :  { %1636 = vmatpush.bf16.msra.mxu1 %v3503_v5  ;;  %v3935_v5 = vor.u32 %v4839_v61, %v3934_v60  ;;  %v3299_v7 = vor.u32 %v4677_v1, %v3296_v2  ;;  %v3232_v60 = vld [vmem:[%s7432_s1 + $0x118] sm:$0xf0]  ;;  %v4693_v61 = vld [vmem:[%s7432_s1 + $0x20c] sm:$0xf] }
  0x9e   :  { %1649 = vmatpush.bf16.msra.mxu2 %v3631_v6  ;;  %v3171_v6 = vor.u32 %v4645_v62, %v3168_v0  ;;  %v3360_v62 = vld [vmem:[%s7432_s1 + $0x218] sm:$0xf0]  ;;  %v4753_v0 = vld [vmem:[%s7432_s1 + $0x3ec] sm:$0xf] }
  0x9f   :  { %1662 = vmatpush.bf16.msra.mxu3 %v3759_v10  ;;  %v4641_v10 = vld [vmem:[%s7432_s1 + $0x6c] sm:$0xf]  ;;  %v3600_v1 = vld [vmem:[%s7432_s1 + $0x3f8] sm:$0xf0]  ;;  %v3363_v13 = vor.u32 %v4693_v61, %v3360_v62 }
  0xa0   :  { %1624 = vmatpush.bf16.msra.mxu0 %v3359_v17  ;;  %v3919_v17 = vor.u32 %v4835_v9, %v3918_v8  ;;  %v3155_v21 = vor.u32 %v4641_v10, %v3152_v12  ;;  %v4785_v2 = vld [vmem:[%s7432_s1 + $0x4ec] sm:$0xf]  ;;  %v3107_v8 = vor.u32 %v4629_v55, %v3104_v56  ;;  %v3603_v14 = vor.u32 %v4753_v0, %v3600_v1  ;;  %v3808_v55 = vld [vmem:[%s7432_s1 + $0x598] sm:$0xf0] }
  0xa1   :  { %1637 = vmatpush.bf16.msra.mxu1 %v3487_v25  ;;  %v4831_v25 = vld [vmem:[%s7432_s1 + $0x654] sm:$0xf0]  ;;  %v4849_v10 = vld [vmem:[%s7432_s1 + $0x6ec] sm:$0xf]  ;;  %v3731_v15 = vor.u32 %v4785_v2, %v3728_v4  ;;  %v3536_v2 = vld [vmem:[%s7432_s1 + $0x378] sm:$0xf0] }
  0xa2   :  { %1650 = vmatpush.bf16.msra.mxu2 %v3615_v26  ;;  %v4637_v26 = vld [vmem:[%s7432_s1 + $0x4c] sm:$0xf]  ;;  %v3903_v33 = vor.u32 %v4831_v25, %v3902_v24  ;;  %v3712_v25 = vld [vmem:[%s7432_s1 + $0x4d8] sm:$0xf0] }
  0xa3   :  { %1663 = vmatpush.bf16.msra.mxu3 %v3743_v29  ;;  %1625 = vmatmul.bf16.vlgmr.msra.gmra.mxu0 %v5348_v18  ;;  %v4669_v29 = vld [vmem:[%s7432_s1 + $0x14c] sm:$0xf]  ;;  %v3139_v35 = vor.u32 %v4637_v26, %v3136_v28 }
  0xa4   :  { %1669 = vmatpush.bf16.msrb.mxu0 %v3983_v30  ;;  %1638 = vmatmul.bf16.vlgmr.msra.gmra.mxu1 %v5352_v20  ;;  %v3264_v30 = vld [vmem:[%s7432_s1 + $0x158] sm:$0xf0]  ;;  %v4813_v26 = vld [vmem:[%s7432_s1 + $0x5cc] sm:$0xf] }
  0xa5   :  { %1682 = vmatpush.bf16.msrb.mxu1 %v3219_v31  ;;  %1651 = vmatmul.bf16.vlgmr.msra.gmra.mxu2 %v5512_v40  ;;  %v4701_v31 = vld [vmem:[%s7432_s1 + $0x24c] sm:$0xf] }
  0xa6   :  { %1695 = vmatpush.bf16.msrb.mxu2 %v3347_v32  ;;  %1664 = vmatmul.bf16.vlgmr.msra.gmra.mxu3 %v5514_v41  ;;  %v3392_v32 = vld [vmem:[%s7432_s1 + $0x258] sm:$0xf0]  ;;  %v4845_v28 = vld [vmem:[%s7432_s1 + $0x6cc] sm:$0xf] }
  0xa7   :  { %1708 = vmatpush.bf16.msrb.mxu3 %v3475_v36  ;;  %v3267_v36 = vor.u32 %v4669_v29, %v3264_v30  ;;  %v3395_v44 = vor.u32 %v4701_v31, %v3392_v32  ;;  %v3968_v29 = vld [vmem:[%s7432_s1 + $0x6d8] sm:$0xf0]  ;;  %v4837_v56 = vld [vmem:[%s7432_s1 + $0x68c] sm:$0xf] }
  0xa8   :  { %1670 = vmatpush.bf16.msrb.mxu0 %v3967_v45  ;;  %v3120_v45 = vld [vmem:[%s7432_s1 + $0x38] sm:$0xf0]  ;;  %v4737_v1 = vld [vmem:[%s7432_s1 + $0x36c] sm:$0xf] }
  0xa9   :  { %1683 = vmatpush.bf16.msrb.mxu1 %v3203_v46  ;;  %v4665_v46 = vld [vmem:[%s7432_s1 + $0x12c] sm:$0xf]  ;;  %v3123_v53 = vor.u32 %v4633_v42, %v3120_v45  ;;  %v3971_v42 = vor.u32 %v4845_v28, %v3968_v29  ;;  %v6419_v28 = vld [vmem:[%s7434_s2] sm:$0xf] }
  0xaa   :  { %1696 = vmatpush.bf16.msrb.mxu2 %v3331_v47  ;;  %v3248_v47 = vld [vmem:[%s7432_s1 + $0x138] sm:$0xf0]  ;;  %v4809_v45 = vld [vmem:[%s7432_s1 + $0x5ac] sm:$0xf] }
  0xab   :  { %1709 = vmatpush.bf16.msrb.mxu3 %v3459_v51  ;;  %v3870_v51 = vld [vmem:[%s7432_s1 + $0x608] sm:$0xf]  ;;  %v3251_v54 = vor.u32 %v4665_v46, %v3248_v47  ;;  %v3824_v46 = vld [vmem:[%s7432_s1 + $0x5b8] sm:$0xf0]  ;;  %v4841_v47 = vld [vmem:[%s7432_s1 + $0x6ac] sm:$0xf] }
  0xac   :  { %1671 = vmatpush.bf16.msrb.mxu0 %v3951_v57  ;;  %v6204_v34 = vpop.f32.mrf.mxu0  ;;  %v4661_v57 = vld [vmem:[%s7432_s1 + $0x10c] sm:$0xf]  ;;  %v3871_v3 = vor.u32 %v4823_v52, %v3870_v51  ;;  %v3827_v51 = vor.u32 %v4809_v45, %v3824_v46  ;;  %v3552_v52 = vld [vmem:[%s7432_s1 + $0x398] sm:$0xf0] }
  0xad   :  { %1684 = vmatpush.bf16.msrb.mxu1 %v3187_v58  ;;  %v6215_v43 = vpop.f32.mrf.mxu1  ;;  %v6247_v58 = vpop.f32.mrf.mxu2  ;;  %v3235_v9 = vor.u32 %v4661_v57, %v3232_v60  ;;  %v3936_v57 = vld [vmem:[%s7432_s1 + $0x698] sm:$0xf0]  ;;  %v4825_v46 = vld [vmem:[%s7432_s1 + $0x62c] sm:$0xf] }
  0xae   :  { %1697 = vmatpush.bf16.msrb.mxu2 %v3315_v59  ;;  %v3379_v59 = vor.u32 %v4697_v48, %v3376_v49  ;;  %v3952_v48 = vld [vmem:[%s7432_s1 + $0x6b8] sm:$0xf0]  ;;  %v3939_v4 = vor.u32 %v4837_v56, %v3936_v57  ;;  %v4821_v57 = vld [vmem:[%s7432_s1 + $0x60c] sm:$0xf] }
  0xaf   :  { %1710 = vmatpush.bf16.msrb.mxu3 %v3443_v63  ;;  %v6258_v63 = vpop.f32.mrf.mxu3  ;;  %v3760_v45 = vld [vmem:[%s7432_s1 + $0x538] sm:$0xf0] }
  0xb0   :  { %1672 = vmatpush.bf16.msrb.mxu0 %v3935_v5  ;;  %v4817_v5 = vld [vmem:[%s7432_s1 + $0x5ec] sm:$0xf]  ;;  %v3744_v56 = vld [vmem:[%s7432_s1 + $0x518] sm:$0xf0] }
  0xb1   :  { %1685 = vmatpush.bf16.msrb.mxu1 %v3171_v6  ;;  %v3856_v6 = vld [vmem:[%s7432_s1 + $0x5f8] sm:$0xf0] }
  0xb2   :  { %1698 = vmatpush.bf16.msrb.mxu2 %v3299_v7  ;;  %v3859_v16 = vor.u32 %v4817_v5, %v3856_v6  ;;  %v3664_v5 = vld [vmem:[%s7432_s1 + $0x478] sm:$0xf0]  ;;  %v4801_v6 = vld [vmem:[%s7432_s1 + $0x56c] sm:$0xf] }
  0xb3   :  { %1711 = vmatpush.bf16.msrb.mxu3 %v3427_v11  ;;  %v3984_v11 = vld [vmem:[%s7432_s1 + $0x6f8] sm:$0xf0] }
  0xb4   :  { %1673 = vmatpush.bf16.msrb.mxu0 %v3919_v17  ;;  %v1420_v7 = vpop.f32.mrf.mxu0  ;;  %v4749_v17 = vld [vmem:[%s7432_s1 + $0x3cc] sm:$0xf]  ;;  %v3987_v24 = vor.u32 %v4849_v10, %v3984_v11  ;;  %v3539_v10 = vor.u32 %v4737_v1, %v3536_v2 }
  0xb5   :  { %1686 = vmatpush.bf16.msrb.mxu1 %v3155_v21  ;;  %v1433_v12 = vpop.f32.mrf.mxu1  ;;  %v3584_v21 = vld [vmem:[%s7432_s1 + $0x3d8] sm:$0xf0]  ;;  %v1446_v30 = vpop.f32.mrf.mxu2 }
  0xb6   :  { %1699 = vmatpush.bf16.msrb.mxu2 %v3283_v23  ;;  %v4781_v23 = vld [vmem:[%s7432_s1 + $0x4cc] sm:$0xf]  ;;  %v3587_v31 = vor.u32 %v4749_v17, %v3584_v21  ;;  %v3792_v7 = vld [vmem:[%s7432_s1 + $0x578] sm:$0xf0] }
  0xb7   :  { %1712 = vmatpush.bf16.msrb.mxu3 %v3411_v27  ;;  %v3840_v27 = vld [vmem:[%s7432_s1 + $0x5d8] sm:$0xf0]  ;;  %v1459_v32 = vpop.f32.mrf.mxu3  ;;  %v3795_v12 = vor.u32 %v4801_v6, %v3792_v7 }
  0xb8   :  { %1674 = vmatpush.bf16.msrb.mxu0 %v3903_v33  ;;  %v3715_v33 = vor.u32 %v4781_v23, %v3712_v25  ;;  %v3648_v21 = vld [vmem:[%s7432_s1 + $0x458] sm:$0xf0]  ;;  %v4797_v23 = vld [vmem:[%s7432_s1 + $0x54c] sm:$0xf] }
  0xb9   :  { %1687 = vmatpush.bf16.msrb.mxu1 %v3139_v35  ;;  %v3843_v35 = vor.u32 %v4813_v26, %v3840_v27  ;;  %v4829_v25 = vld [vmem:[%s7432_s1 + $0x64c] sm:$0xf]  ;;  %v3904_v26 = vld [vmem:[%s7432_s1 + $0x658] sm:$0xf0] }
  0xba   :  { %1700 = vmatpush.bf16.msrb.mxu2 %v3267_v36  ;;  %v4745_v36 = vld [vmem:[%s7432_s1 + $0x3ac] sm:$0xf] }
  0xbb   :  { %1713 = vmatpush.bf16.msrb.mxu3 %v3395_v44  ;;  %v3696_v44 = vld [vmem:[%s7432_s1 + $0x4b8] sm:$0xf0]  ;;  %v3571_v49 = vor.u32 %v4745_v36, %v3568_v38  ;;  %v4761_v38 = vld [vmem:[%s7432_s1 + $0x42c] sm:$0xf] }
  0xbc   :  { %1675 = vmatpush.bf16.msrb.mxu0 %v3887_v50  ;;  %v3699_v50 = vor.u32 %v4777_v39, %v3696_v44  ;;  %v3504_v36 = vld [vmem:[%s7432_s1 + $0x338] sm:$0xf0]  ;;  %v3907_v39 = vor.u32 %v4829_v25, %v3904_v26  ;;  %v4793_v44 = vld [vmem:[%s7432_s1 + $0x52c] sm:$0xf] }
  0xbd   :  { %1688 = vmatpush.bf16.msrb.mxu1 %v3123_v53  ;;  %v3955_v53 = vor.u32 %v4841_v47, %v3952_v48  ;;  %v3888_v47 = vld [vmem:[%s7432_s1 + $0x638] sm:$0xf0]  ;;  %v256_v48 = vperm.slane %v6419_v28, 0 }
  0xbe   :  { %1701 = vmatpush.bf16.msrb.mxu2 %v3251_v54  ;;  %v4805_v54 = vld [vmem:[%s7432_s1 + $0x58c] sm:$0xf] }
  0xbf   :  { %1714 = vmatpush.bf16.msrb.mxu3 %v3379_v59  ;;  %v3811_v0 = vor.u32 %v4805_v54, %v3808_v55  ;;  %v3891_v54 = vor.u32 %v4825_v46, %v3888_v47  ;;  %v4789_v55 = vld [vmem:[%s7432_s1 + $0x50c] sm:$0xf]  ;;  %v4862_v46 = vld [vmem:[%s7435_s3 + $0x4c] sm:$0xf0] }
  0xc0   :  { %1676 = vmatpush.bf16.msrb.mxu0 %v3871_v3  ;;  %v6360_v60 = vpop.f32.mrf.mxu0  ;;  %v4769_v3 = vld [vmem:[%s7432_s1 + $0x46c] sm:$0xf]  ;;  %v3747_v6 = vor.u32 %v4789_v55, %v3744_v56  ;;  %v4858_v56 = vld [vmem:[%s7435_s3 + $0x2c] sm:$0xf0] }
  0xc1   :  { %1689 = vmatpush.bf16.msrb.mxu1 %v3107_v8  ;;  %v6362_v61 = vpop.f32.mrf.mxu1  ;;  %v4833_v8 = vld [vmem:[%s7432_s1 + $0x66c] sm:$0xf]  ;;  %v3667_v11 = vor.u32 %v4769_v3, %v3664_v5  ;;  %v4230_v3 = vld [vmem:[%s7435_s3 + $0x1e0] sm:$0xf] }
  0xc2   :  { %1702 = vmatpush.bf16.msrb.mxu2 %v3235_v9  ;;  %v3920_v9 = vld [vmem:[%s7432_s1 + $0x678] sm:$0xf0] }
  0xc3   :  { %1715 = vmatpush.bf16.msrb.mxu3 %v3363_v13  ;;  %1677 = vmatmul.bf16.vlgmr.msrb.gmra.mxu0 %v5504_v37  ;;  %v4733_v13 = vld [vmem:[%s7432_s1 + $0x34c] sm:$0xf]  ;;  %v3923_v17 = vor.u32 %v4833_v8, %v3920_v9  ;;  %v1419_v9 = vadd.f32 %v6204_v34, %v256_v48  ;;  %v4358_v48 = vld [vmem:[%s7435_s3 + $0x2e0] sm:$0xf] }
  0xc4   :  { %1721 = vmatpush.bf16.msra.mxu0 %v3603_v14  ;;  %1690 = vmatmul.bf16.vlgmr.msrb.gmra.mxu1 %v5350_v19  ;;  %v3680_v19 = vld [vmem:[%s7432_s1 + $0x498] sm:$0xf0] }
  0xc5   :  { %1734 = vmatpush.bf16.msra.mxu1 %v3731_v15  ;;  %1703 = vmatmul.bf16.vlgmr.msrb.gmra.mxu2 %v5354_v22  ;;  %v4741_v22 = vld [vmem:[%s7432_s1 + $0x38c] sm:$0xf]  ;;  %v3520_v14 = vld [vmem:[%s7432_s1 + $0x358] sm:$0xf0] }
  0xc6   :  { %1747 = vmatpush.bf16.msra.mxu2 %v3859_v16  ;;  %1716 = vmatmul.bf16.vlgmr.msrb.gmra.mxu3 %v5348_v18  ;;  %v4773_v18 = vld [vmem:[%s7432_s1 + $0x48c] sm:$0xf]  ;;  %v3555_v59 = vor.u32 %v4741_v22, %v3552_v52  ;;  %v3523_v29 = vor.u32 %v4733_v13, %v3520_v14  ;;  %v3763_v22 = vor.u32 %v4793_v44, %v3760_v45  ;;  %v3488_v52 = vld [vmem:[%s7432_s1 + $0x318] sm:$0xf0]  ;;  %v4214_v13 = vld [vmem:[%s7435_s3 + $0x1c0] sm:$0xf] }
  0xc7   :  { %1760 = vmatpush.bf16.msra.mxu3 %v3987_v24  ;;  %v3683_v62 = vor.u32 %v4773_v18, %v3680_v19  ;;  %v4765_v15 = vld [vmem:[%s7432_s1 + $0x44c] sm:$0xf]  ;;  %v3776_v24 = vld [vmem:[%s7432_s1 + $0x558] sm:$0xf0]  ;;  %v4910_v14 = vld [vmem:[%s7435_s3 + $0x1cc] sm:$0xf0] }
  0xc8   :  { %1722 = vmatpush.bf16.msra.mxu0 %v3587_v31  ;;  %v6397_v16 = vpop.f32.mrf.mxu2  ;;  %v1472_v30 = vpop.f32.mrf.mxu0  ;;  %v3651_v32 = vor.u32 %v4765_v15, %v3648_v21  ;;  %v4757_v18 = vld [vmem:[%s7432_s1 + $0x40c] sm:$0xf]  ;;  %v1432_v15 = vadd.f32 %v6215_v43, %v1419_v9  ;;  %v4070_v21 = vld [vmem:[%s7435_s3 + $0xa0] sm:$0xf] }
  0xc9   :  { %1735 = vmatpush.bf16.msra.mxu1 %v3715_v33  ;;  %v6414_v27 = vpop.f32.mrf.mxu3  ;;  %v1485_v31 = vpop.f32.mrf.mxu1  ;;  %v3779_v33 = vor.u32 %v4797_v23, %v3776_v24  ;;  %v4874_v23 = vld [vmem:[%s7435_s3 + $0xac] sm:$0xf0]  ;;  %v4198_v43 = vld [vmem:[%s7435_s3 + $0x1a0] sm:$0xf] }
  0xca   :  { %1748 = vmatpush.bf16.msra.mxu2 %v3843_v35  ;;  %v4729_v35 = vld [vmem:[%s7432_s1 + $0x32c] sm:$0xf]  ;;  %v4071_v24 = vor.u32 %v4874_v23, %v4070_v21  ;;  %v1445_v25 = vadd.f32 %v6247_v58, %v1432_v15  ;;  %v4326_v9 = vld [vmem:[%s7435_s3 + $0x2a0] sm:$0xf]  ;;  %v4232_v15 = vld [vmem:[%s7435_s3 + $0x1f0] sm:$0xf0] }
  0xcb   :  { %1761 = vmatpush.bf16.msra.mxu3 %v3971_v42  ;;  %v3632_v42 = vld [vmem:[%s7432_s1 + $0x438] sm:$0xf0] }
  0xcc   :  { %1723 = vmatpush.bf16.msra.mxu0 %v3571_v49  ;;  %v3507_v49 = vor.u32 %v4729_v35, %v3504_v36  ;;  %v1458_v31 = vadd.f32 %v6258_v63, %v1445_v25  ;;  %v4866_v35 = vld [vmem:[%s7435_s3 + $0x6c] sm:$0xf0] }
  0xcd   :  { %1736 = vmatpush.bf16.msra.mxu1 %v3699_v50  ;;  %v4725_v50 = vld [vmem:[%s7432_s1 + $0x30c] sm:$0xf]  ;;  %v4898_v63 = vld [vmem:[%s7435_s3 + $0x16c] sm:$0xf0] }
  0xce   :  { %1749 = vmatpush.bf16.msra.mxu2 %v3827_v51  ;;  %v3635_v51 = vor.u32 %v4761_v38, %v3632_v42  ;;  %v3491_v2 = vor.u32 %v4725_v50, %v3488_v52  ;;  %v4166_v38 = vld [vmem:[%s7435_s3 + $0x160] sm:$0xf]  ;;  %v1471_v44 = vadd.f32 %v6360_v60, %v1458_v31  ;;  %v4894_v50 = vld [vmem:[%s7435_s3 + $0x14c] sm:$0xf0]  ;;  %v257_v52 = vperm.slane %v6419_v28, 1 }
  0xcf   :  { %1762 = vmatpush.bf16.msra.mxu3 %v3955_v53  ;;  %v3616_v53 = vld [vmem:[%s7432_s1 + $0x418] sm:$0xf0]  ;;  %v4022_v42 = vld [vmem:[%s7435_s3 + $0x40] sm:$0xf]  ;;  %v4167_v45 = vor.u32 %v4898_v63, %v4166_v38  ;;  %v4934_v25 = vld [vmem:[%s7435_s3 + $0x28c] sm:$0xf0] }
  0xd0   :  { %1724 = vmatpush.bf16.msra.mxu0 %v3555_v59  ;;  %v1498_v19 = vpop.f32.mrf.mxu2  ;;  %v3872_v59 = vld [vmem:[%s7432_s1 + $0x618] sm:$0xf0]  ;;  %v3619_v5 = vor.u32 %v4757_v18, %v3616_v53  ;;  %v4150_v60 = vld [vmem:[%s7435_s3 + $0x140] sm:$0xf]  ;;  %v4023_v18 = vor.u32 %v4862_v46, %v4022_v42  ;;  %v4072_v63 = vld [vmem:[%s7435_s3 + $0xb0] sm:$0xf0] }
  0xd1   :  { %1737 = vmatpush.bf16.msra.mxu1 %v3683_v62  ;;  %v4102_v62 = vld [vmem:[%s7435_s3 + $0xe0] sm:$0xf]  ;;  %v1511_v1 = vpop.f32.mrf.mxu3  ;;  %v3875_v7 = vor.u32 %v4821_v57, %v3872_v59  ;;  %v4151_v55 = vor.u32 %v4894_v50, %v4150_v60  ;;  %v4904_v42 = vld [vmem:[%s7435_s3 + $0x1a4] sm:$0xf] }
  0xd2   :  { %1750 = vmatpush.bf16.msra.mxu2 %v3811_v0  ;;  %v4882_v0 = vld [vmem:[%s7435_s3 + $0xec] sm:$0xf0]  ;;  %v4006_v53 = vld [vmem:[%s7435_s3 + $0x20] sm:$0xf]  ;;  %v4868_v50 = vld [vmem:[%s7435_s3 + $0x84] sm:$0xf] }
  0xd3   :  { %1763 = vmatpush.bf16.msra.mxu3 %v3939_v4  ;;  %v4914_v4 = vld [vmem:[%s7435_s3 + $0x1ec] sm:$0xf0]  ;;  %v4103_v8 = vor.u32 %v4882_v0, %v4102_v62  ;;  %v4342_v59 = vld [vmem:[%s7435_s3 + $0x2c0] sm:$0xf] }
  0xd4   :  { %1725 = vmatpush.bf16.msra.mxu0 %v3539_v10  ;;  %v4231_v10 = vor.u32 %v4914_v4, %v4230_v3  ;;  %v4942_v62 = vld [vmem:[%s7435_s3 + $0x2cc] sm:$0xf0]  ;;  %v4134_v0 = vld [vmem:[%s7435_s3 + $0x120] sm:$0xf]  ;;  %v4007_v3 = vor.u32 %v4858_v56, %v4006_v53 }
  0xd5   :  { %1738 = vmatpush.bf16.msra.mxu1 %v3667_v11  ;;  %v4086_v11 = vld [vmem:[%s7435_s3 + $0xc0] sm:$0xf]  ;;  %v4343_v1 = vor.u32 %v4942_v62, %v4342_v59  ;;  %v4922_v56 = vld [vmem:[%s7435_s3 + $0x22c] sm:$0xf0] }
  0xd6   :  { %1751 = vmatpush.bf16.msra.mxu2 %v3795_v12  ;;  %v4878_v12 = vld [vmem:[%s7435_s3 + $0xcc] sm:$0xf0]  ;;  %v3990_v4 = vld [vmem:[%s7435_s3] sm:$0xf] }
  0xd7   :  { %1764 = vmatpush.bf16.msra.mxu3 %v3923_v17  ;;  %v4087_v34 = vor.u32 %v4878_v12, %v4086_v11  ;;  %v4215_v17 = vor.u32 %v4910_v14, %v4214_v13  ;;  %v4886_v11 = vld [vmem:[%s7435_s3 + $0x10c] sm:$0xf0]  ;;  %v4104_v12 = vld [vmem:[%s7435_s3 + $0xf0] sm:$0xf0] }
  0xd8   :  { %1726 = vmatpush.bf16.msra.mxu0 %v3523_v29  ;;  %v4182_v29 = vld [vmem:[%s7435_s3 + $0x180] sm:$0xf] }
  0xd9   :  { %1739 = vmatpush.bf16.msra.mxu1 %v3651_v32 }
  0xda   :  { %1752 = vmatpush.bf16.msra.mxu2 %v3779_v33  ;;  %v4038_v33 = vld [vmem:[%s7435_s3 + $0x60] sm:$0xf] }
  0xdb   :  { %1765 = vmatpush.bf16.msra.mxu3 %v3907_v39  ;;  %v4039_v39 = vor.u32 %v4866_v35, %v4038_v33  ;;  %v4294_v33 = vld [vmem:[%s7435_s3 + $0x260] sm:$0xf]  ;;  %v4930_v35 = vld [vmem:[%s7435_s3 + $0x26c] sm:$0xf0] }
  0xdc   :  { %1727 = vmatpush.bf16.msra.mxu0 %v3507_v49  ;;  %v4946_v49 = vld [vmem:[%s7435_s3 + $0x2ec] sm:$0xf0] }
  0xdd   :  { %1740 = vmatpush.bf16.msra.mxu1 %v3635_v51 }
  0xde   :  { %1753 = vmatpush.bf16.msra.mxu2 %v3763_v22  ;;  %v4359_v22 = vor.u32 %v4946_v49, %v4358_v48  ;;  %v4278_v48 = vld [vmem:[%s7435_s3 + $0x240] sm:$0xf]  ;;  %v4926_v49 = vld [vmem:[%s7435_s3 + $0x24c] sm:$0xf0] }
  0xdf   :  { %1766 = vmatpush.bf16.msra.mxu3 %v3891_v54  ;;  %v1484_v54 = vadd.f32 %v6362_v61, %v1471_v44  ;;  %v4890_v61 = vld [vmem:[%s7435_s3 + $0x12c] sm:$0xf0]  ;;  %v4200_v44 = vld [vmem:[%s7435_s3 + $0x1b0] sm:$0xf0] }
  0xe0   :  { %1728 = vmatpush.bf16.msra.mxu0 %v3491_v2  ;;  %v1522_v30 = vpop.f32.mrf.mxu0  ;;  %v1510_v2 = vadd.f32 %v6414_v27, %v257_v52  ;;  %v4203_v60 = vor.u32 %v4904_v42, %v4200_v44  ;;  %v4900_v52 = vld [vmem:[%s7435_s3 + $0x184] sm:$0xf]  ;;  %v4110_v42 = vld [vmem:[%s7435_s3 + $0xe8] sm:$0xf]  ;;  %v4883_v44 = vld [vmem:[%s7435_s3 + $0xf4] sm:$0xf0] }
  0xe1   :  { %1741 = vmatpush.bf16.msra.mxu1 %v3619_v5  ;;  %v6532_v36 = vpop.f32.mrf.mxu1  ;;  %v4854_v5 = vld [vmem:[%s7435_s3 + $0xc] sm:$0xf0] }
  0xe2   :  { %1754 = vmatpush.bf16.msra.mxu2 %v3747_v6  ;;  %v1497_v6 = vadd.f32 %v6397_v16, %v1484_v54  ;;  %v4880_v16 = vld [vmem:[%s7435_s3 + $0xe4] sm:$0xf]  ;;  %v3991_v21 = vor.u32 %v4854_v5, %v3990_v4 }
  0xe3   :  { %1767 = vmatpush.bf16.msra.mxu3 %v3875_v7  ;;  %1729 = vmatmul.bf16.vlgmr.msra.gmra.mxu0 %v5352_v20  ;;  %v4906_v20 = vld [vmem:[%s7435_s3 + $0x1ac] sm:$0xf0]  ;;  %v4135_v7 = vor.u32 %v4890_v61, %v4134_v0  ;;  %v4040_v0 = vld [vmem:[%s7435_s3 + $0x70] sm:$0xf0]  ;;  %v4860_v4 = vld [vmem:[%s7435_s3 + $0x44] sm:$0xf] }
  0xe4   :  { %2559 = vmatpush.bf16.msrb.mxu0 %v4103_v8  ;;  %1742 = vmatmul.bf16.vlgmr.msra.gmra.mxu1 %v5512_v40  ;;  %v4199_v26 = vor.u32 %v4906_v20, %v4198_v43  ;;  %v4054_v40 = vld [vmem:[%s7435_s3 + $0x80] sm:$0xf]  ;;  %v1773_v23 = vmax.f32 %v1497_v6, 0.0  ;;  %v4107_v20 = vor.u32 %v4880_v16, %v4104_v12  ;;  %v4024_v6 = vld [vmem:[%s7435_s3 + $0x50] sm:$0xf0] }
  0xe5   :  { %2572 = vmatpush.bf16.msrb.mxu1 %v4231_v10  ;;  %1755 = vmatmul.bf16.vlgmr.msra.gmra.mxu2 %v5514_v41  ;;  %v4870_v41 = vld [vmem:[%s7435_s3 + $0x8c] sm:$0xf0]  ;;  %v4118_v8 = vld [vmem:[%s7435_s3 + $0x100] sm:$0xf]  ;;  %v4360_v16 = vld [vmem:[%s7435_s3 + $0x2f0] sm:$0xf0] }
  0xe6   :  { %1768 = vmatmul.bf16.vlgmr.msra.gmra.mxu3 %v5504_v37  ;;  %v4902_v37 = vld [vmem:[%s7435_s3 + $0x18c] sm:$0xf0]  ;;  %v4055_v58 = vor.u32 %v4870_v41, %v4054_v40  ;;  %2585 = vmatpush.bf16.msrb.mxu2 %v4359_v22  ;;  %v4119_v43 = vor.u32 %v4886_v11, %v4118_v8  ;;  %v4876_v40 = vld [vmem:[%s7435_s3 + $0xc4] sm:$0xf]  ;;  %v4088_v41 = vld [vmem:[%s7435_s3 + $0xd0] sm:$0xf0]  ;;  %v6634_v31 = vpack.c.bf16 %v1773_v23, %v1773_v23 }
  0xe7   :  { %v4183_v32 = vor.u32 %v4902_v37, %v4182_v29  ;;  %v4938_v10 = vld [vmem:[%s7435_s3 + $0x2ac] sm:$0xf0]  ;;  %v4908_v37 = vld [vmem:[%s7435_s3 + $0x1c4] sm:$0xf]  ;;  %v4279_v22 = vor.u32 %v4926_v49, %v4278_v48  ;;  %v4238_v48 = vld [vmem:[%s7435_s3 + $0x1e8] sm:$0xf] }
  0xe8   :  { %2560 = vmatpush.bf16.msrb.mxu0 %v4087_v34  ;;  %v6547_v47 = vpop.f32.mrf.mxu2  ;;  %v1524_v19 = vpop.f32.mrf.mxu0  ;;  %v4327_v14 = vor.u32 %v4938_v10, %v4326_v9  ;;  %v4912_v34 = vld [vmem:[%s7435_s3 + $0x1e4] sm:$0xf]  ;;  %v4918_v8 = vld [vmem:[%s7435_s3 + $0x20c] sm:$0xf0]  ;;  %v4915_v49 = vld [vmem:[%s7435_s3 + $0x1f4] sm:$0xf0] }
  0xe9   :  { %2573 = vmatpush.bf16.msrb.mxu1 %v4215_v17  ;;  %v6561_v51 = vpop.f32.mrf.mxu3  ;;  %v1537_v57 = vpop.f32.mrf.mxu1  ;;  %v1523_v17 = vadd.f32 %v1522_v30, %v1510_v2  ;;  %v4168_v2 = vld [vmem:[%s7435_s3 + $0x170] sm:$0xf0]  ;;  %v4944_v11 = vld [vmem:[%s7435_s3 + $0x2e4] sm:$0xf] }
  0xea   :  { %2586 = vmatpush.bf16.msrb.mxu2 %v4343_v1  ;;  %v4896_v1 = vld [vmem:[%s7435_s3 + $0x164] sm:$0xf] }
  0xeb   :  { %v1536_v30 = vadd.f32 %v6532_v36, %v1523_v17  ;;  %v4872_v36 = vld [vmem:[%s7435_s3 + $0xa4] sm:$0xf]  ;;  %v4171_v9 = vor.u32 %v4896_v1, %v4168_v2  ;;  %v4027_v17 = vor.u32 %v4860_v4, %v4024_v6  ;;  %v4078_v2 = vld [vmem:[%s7435_s3 + $0xa8] sm:$0xf]  ;;  %v4970_v4 = vld [vmem:[%s7435_s3 + $0x3ac] sm:$0xf0] }
  0xec   :  { %2561 = vmatpush.bf16.msrb.mxu0 %v4071_v24  ;;  %v4310_v24 = vld [vmem:[%s7435_s3 + $0x280] sm:$0xf]  ;;  %v4075_v46 = vor.u32 %v4872_v36, %v4072_v63  ;;  %v4892_v12 = vld [vmem:[%s7435_s3 + $0x144] sm:$0xf]  ;;  %v4978_v63 = vld [vmem:[%s7435_s3 + $0x3ec] sm:$0xf0] }
  0xed   :  { %2574 = vmatpush.bf16.msrb.mxu1 %v4199_v26  ;;  %v4235_v26 = vor.u32 %v4912_v34, %v4232_v15  ;;  %v4311_v29 = vor.u32 %v4934_v25, %v4310_v24  ;;  %v4008_v24 = vld [vmem:[%s7435_s3 + $0x30] sm:$0xf0]  ;;  %v4486_v36 = vld [vmem:[%s7435_s3 + $0x3e0] sm:$0xf]  ;;  %v4875_v6 = vld [vmem:[%s7435_s3 + $0xb4] sm:$0xf0] }
  0xee   :  { %2587 = vmatpush.bf16.msrb.mxu2 %v4327_v14  ;;  %v4363_v14 = vor.u32 %v4944_v11, %v4360_v16  ;;  %v4079_v16 = vor.u32 %v4875_v6, %v4078_v2  ;;  %v4891_v2 = vld [vmem:[%s7435_s3 + $0x134] sm:$0xf0] }
  0xf0   :  { %2562 = vmatpush.bf16.msrb.mxu0 %v4055_v58  ;;  %v1550_v27 = vpop.f32.mrf.mxu2  ;;  %v4216_v58 = vld [vmem:[%s7435_s3 + $0x1d0] sm:$0xf0] }
  0xf1   :  { %2575 = vmatpush.bf16.msrb.mxu1 %v4183_v32  ;;  %v1563_v13 = vpop.f32.mrf.mxu3  ;;  %v4091_v32 = vor.u32 %v4876_v40, %v4088_v41  ;;  %v4219_v38 = vor.u32 %v4908_v37, %v4216_v58  ;;  %v4344_v40 = vld [vmem:[%s7435_s3 + $0x2d0] sm:$0xf0]  ;;  %v4888_v41 = vld [vmem:[%s7435_s3 + $0x124] sm:$0xf] }
  0xf2   :  { %2588 = vmatpush.bf16.msrb.mxu2 %v4311_v29  ;;  %v4152_v13 = vld [vmem:[%s7435_s3 + $0x150] sm:$0xf0]  ;;  %v4852_v58 = vld [vmem:[%s7435_s3 + $0x4] sm:$0xf] }
  0xf3   :  { %v4136_v29 = vld [vmem:[%s7435_s3 + $0x130] sm:$0xf0] }
  0xf4   :  { %2563 = vmatpush.bf16.msrb.mxu0 %v4039_v39  ;;  %v4295_v39 = vor.u32 %v4930_v35, %v4294_v33  ;;  %v4884_v33 = vld [vmem:[%s7435_s3 + $0x104] sm:$0xf]  ;;  %v4120_v35 = vld [vmem:[%s7435_s3 + $0x110] sm:$0xf0] }
  0xf5   :  { %2576 = vmatpush.bf16.msrb.mxu1 %v4167_v45  ;;  %v1549_v45 = vadd.f32 %v6547_v47, %v1536_v30  ;;  %v4056_v47 = vld [vmem:[%s7435_s3 + $0x90] sm:$0xf0] }
  0xf6   :  { %2589 = vmatpush.bf16.msrb.mxu2 %v4295_v39  ;;  %v4059_v54 = vor.u32 %v4868_v50, %v4056_v47  ;;  %v4936_v39 = vld [vmem:[%s7435_s3 + $0x2a4] sm:$0xf] }
  0xf7   :  { %v1562_v53 = vadd.f32 %v6561_v51, %v1549_v45  ;;  %v4864_v51 = vld [vmem:[%s7435_s3 + $0x64] sm:$0xf]  ;;  %v4487_v45 = vor.u32 %v4978_v63, %v4486_v36  ;;  %v4174_v36 = vld [vmem:[%s7435_s3 + $0x168] sm:$0xf]  ;;  %v4899_v63 = vld [vmem:[%s7435_s3 + $0x174] sm:$0xf0] }
  0xf8   :  { %2564 = vmatpush.bf16.msrb.mxu0 %v4023_v18  ;;  %v4184_v18 = vld [vmem:[%s7435_s3 + $0x190] sm:$0xf0]  ;;  %v4043_v5 = vor.u32 %v4864_v51, %v4040_v0  ;;  %v4222_v51 = vld [vmem:[%s7435_s3 + $0x1c8] sm:$0xf]  ;;  %v4911_v0 = vld [vmem:[%s7435_s3 + $0x1d4] sm:$0xf0] }
  0xf9   :  { %2577 = vmatpush.bf16.msrb.mxu1 %v4151_v55  ;;  %v4262_v55 = vld [vmem:[%s7435_s3 + $0x220] sm:$0xf]  ;;  %v4187_v59 = vor.u32 %v4900_v52, %v4184_v18  ;;  %2598 = vmatpush.bf16.msrb.mxu3 %v4487_v45  ;;  %v4123_v52 = vor.u32 %v4884_v33, %v4120_v35  ;;  %v4111_v18 = vor.u32 %v4883_v44, %v4110_v42  ;;  %v4920_v35 = vld [vmem:[%s7435_s3 + $0x224] sm:$0xf] }
  0xfa   :  { %2590 = vmatpush.bf16.msrb.mxu2 %v4279_v22  ;;  %v4263_v61 = vor.u32 %v4922_v56, %v4262_v55  ;;  %v4239_v55 = vor.u32 %v4915_v49, %v4238_v48  ;;  %v4879_v56 = vld [vmem:[%s7435_s3 + $0xd4] sm:$0xf0]  ;;  %v4406_v48 = vld [vmem:[%s7435_s3 + $0x340] sm:$0xf]  ;;  %v4958_v49 = vld [vmem:[%s7435_s3 + $0x34c] sm:$0xf0] }
  0xfc   :  { %2565 = vmatpush.bf16.msrb.mxu0 %v4007_v3 }
  0xfd   :  { %2578 = vmatpush.bf16.msrb.mxu1 %v4135_v7  ;;  %v4246_v7 = vld [vmem:[%s7435_s3 + $0x200] sm:$0xf] }
  0xfe   :  { %2591 = vmatpush.bf16.msrb.mxu2 %v4263_v61  ;;  %v4247_v10 = vor.u32 %v4918_v8, %v4246_v7  ;;  %v4928_v8 = vld [vmem:[%s7435_s3 + $0x264] sm:$0xf] }
 0x100   :  { %2566 = vmatpush.bf16.msrb.mxu0 %v3991_v21  ;;  %v1574_v19 = vpop.f32.mrf.mxu0  ;;  %v4856_v21 = vld [vmem:[%s7435_s3 + $0x24] sm:$0xf] }
 0x101   :  { %2579 = vmatpush.bf16.msrb.mxu1 %v4119_v43  ;;  %v1575_v57 = vadd.f32 %v1574_v19, %v1562_v53  ;;  %v1587_v62 = vpop.f32.mrf.mxu1  ;;  %v4011_v30 = vor.u32 %v4856_v21, %v4008_v24  ;;  %v4094_v53 = vld [vmem:[%s7435_s3 + $0xc8] sm:$0xf]  ;;  %v4470_v19 = vld [vmem:[%s7435_s3 + $0x3c0] sm:$0xf]  ;;  %v4280_v24 = vld [vmem:[%s7435_s3 + $0x250] sm:$0xf0] }
 0x102   :  { %2592 = vmatpush.bf16.msrb.mxu2 %v4247_v10  ;;  %v4095_v1 = vor.u32 %v4879_v56, %v4094_v53  ;;  %v4907_v10 = vld [vmem:[%s7435_s3 + $0x1b4] sm:$0xf0]  ;;  %v4062_v21 = vld [vmem:[%s7435_s3 + $0x88] sm:$0xf] }
 0x103   :  { %2567 = vmatmul.bf16.vlgmr.msrb.gmra.mxu0 %v6634_v31  ;;  %v1588_v3 = vadd.f32 %v1587_v62, %v1575_v57  ;;  %v4312_v62 = vld [vmem:[%s7435_s3 + $0x290] sm:$0xf0]  ;;  %v4158_v53 = vld [vmem:[%s7435_s3 + $0x148] sm:$0xf] }
 0x104   :  { %2611 = vmatpush.bf16.msra.mxu0 %v4107_v20  ;;  %v4155_v20 = vor.u32 %v4892_v12, %v4152_v13  ;;  %v4438_v12 = vld [vmem:[%s7435_s3 + $0x380] sm:$0xf]  ;;  %v4966_v13 = vld [vmem:[%s7435_s3 + $0x38c] sm:$0xf0] }
 0x105   :  { %2624 = vmatpush.bf16.msra.mxu1 %v4235_v26  ;;  %v1774_v27 = vmax.f32 %v1588_v3, 0.0  ;;  %v4940_v26 = vld [vmem:[%s7435_s3 + $0x2c4] sm:$0xf]  ;;  %v4454_v3 = vld [vmem:[%s7435_s3 + $0x3a0] sm:$0xf] }
 0x106   :  { %2637 = vmatpush.bf16.msra.mxu2 %v4363_v14  ;;  %v4347_v37 = vor.u32 %v4940_v26, %v4344_v40  ;;  %v4455_v7 = vor.u32 %v4970_v4, %v4454_v3  ;;  %v4924_v14 = vld [vmem:[%s7435_s3 + $0x244] sm:$0xf]  ;;  %v4903_v26 = vld [vmem:[%s7435_s3 + $0x194] sm:$0xf0] }
 0x107   :  { %v6717_v34 = vpack.c.bf16 %v1774_v27, %v1774_v27  ;;  %v4296_v27 = vld [vmem:[%s7435_s3 + $0x270] sm:$0xf0]  ;;  %v4283_v40 = vor.u32 %v4924_v14, %v4280_v24  ;;  %v4887_v14 = vld [vmem:[%s7435_s3 + $0x114] sm:$0xf0] }
 0x108   :  { %2612 = vmatpush.bf16.msra.mxu0 %v4091_v32  ;;  %v6719_v15 = vpop.f32.mrf.mxu2  ;;  %v1576_v43 = vpop.f32.mrf.mxu0  ;;  %v3992_v32 = vld [vmem:[%s7435_s3 + $0x10] sm:$0xf0]  ;;  %v4299_v11 = vor.u32 %v4928_v8, %v4296_v27  ;;  %v4374_v8 = vld [vmem:[%s7435_s3 + $0x300] sm:$0xf]  ;;  %v4950_v27 = vld [vmem:[%s7435_s3 + $0x30c] sm:$0xf0] }
 0x109   :  { %2625 = vmatpush.bf16.msra.mxu1 %v4219_v38  ;;  %v6724_v23 = vpop.f32.mrf.mxu3  ;;  %v1589_v25 = vpop.f32.mrf.mxu1  ;;  %v4139_v38 = vor.u32 %v4888_v41, %v4136_v29  ;;  %v3995_v47 = vor.u32 %v4852_v58, %v3992_v32  ;;  %v4871_v43 = vld [vmem:[%s7435_s3 + $0x94] sm:$0xf0]  ;;  %v4046_v29 = vld [vmem:[%s7435_s3 + $0x68] sm:$0xf]  ;;  %v4962_v58 = vld [vmem:[%s7435_s3 + $0x36c] sm:$0xf0] }
 0x10a   :  { %2580 = vmatmul.bf16.vlgmr.msrb.gmra.mxu1 %v6717_v34  ;;  %2638 = vmatpush.bf16.msra.mxu2 %v4347_v37  ;;  %v4190_v25 = vld [vmem:[%s7435_s3 + $0x188] sm:$0xf]  ;;  %v4063_v41 = vor.u32 %v4871_v43, %v4062_v21  ;;  %v4422_v37 = vld [vmem:[%s7435_s3 + $0x360] sm:$0xf]  ;;  %v4867_v32 = vld [vmem:[%s7435_s3 + $0x74] sm:$0xf0] }
 0x10b   :  { %v4423_v33 = vor.u32 %v4962_v58, %v4422_v37  ;;  %v4047_v45 = vor.u32 %v4867_v32, %v4046_v29  ;;  %v4112_v21 = vld [vmem:[%s7435_s3 + $0xf8] sm:$0xf0]  ;;  %v4972_v29 = vld [vmem:[%s7435_s3 + $0x3c4] sm:$0xf]  ;;  %v4472_v37 = vld [vmem:[%s7435_s3 + $0x3d0] sm:$0xf0] }
 0x10c   :  { %2613 = vmatpush.bf16.msra.mxu0 %v4075_v46  ;;  %v4328_v46 = vld [vmem:[%s7435_s3 + $0x2b0] sm:$0xf0]  ;;  %v4877_v32 = vld [vmem:[%s7435_s3 + $0xcc] sm:$0xf] }
 0x10d   :  { %2626 = vmatpush.bf16.msra.mxu1 %v4203_v60  ;;  %v4331_v50 = vor.u32 %v4936_v39, %v4328_v46  ;;  %v4030_v46 = vld [vmem:[%s7435_s3 + $0x48] sm:$0xf] }
 0x10f   :  { %2639 = vmatpush.bf16.msra.mxu2 %v4331_v50  ;;  %v4863_v50 = vld [vmem:[%s7435_s3 + $0x54] sm:$0xf0] }
 0x110   :  { %2614 = vmatpush.bf16.msra.mxu0 %v4059_v54  ;;  %v1602_v60 = vpop.f32.mrf.mxu2  ;;  %v4974_v54 = vld [vmem:[%s7435_s3 + $0x3cc] sm:$0xf0]  ;;  %v4031_v56 = vor.u32 %v4863_v50, %v4030_v46 }
 0x111   :  { %2627 = vmatpush.bf16.msra.mxu1 %v4187_v59  ;;  %v1615_v22 = vpop.f32.mrf.mxu3  ;;  %v4471_v57 = vor.u32 %v4974_v54, %v4470_v19  ;;  %v4932_v59 = vld [vmem:[%s7435_s3 + $0x284] sm:$0xf]  ;;  %v4175_v60 = vor.u32 %v4899_v63, %v4174_v36  ;;  %v4895_v19 = vld [vmem:[%s7435_s3 + $0x154] sm:$0xf0]  ;;  %v4224_v36 = vld [vmem:[%s7435_s3 + $0x1d8] sm:$0xf0] }
 0x112   :  { %v4315_v61 = vor.u32 %v4932_v59, %v4312_v62  ;;  %v4916_v22 = vld [vmem:[%s7435_s3 + $0x204] sm:$0xf]  ;;  %v4159_v59 = vor.u32 %v4895_v19, %v4158_v53  ;;  %v4014_v62 = vld [vmem:[%s7435_s3 + $0x28] sm:$0xf]  ;;  %v4869_v19 = vld [vmem:[%s7435_s3 + $0x8c] sm:$0xf] }
 0x113   :  { %2599 = vmatpush.bf16.msrb.mxu3 %v4471_v57 }
 0x114   :  { %2615 = vmatpush.bf16.msra.mxu0 %v4043_v5  ;;  %v4223_v5 = vor.u32 %v4911_v0, %v4222_v51  ;;  %2640 = vmatpush.bf16.msra.mxu2 %v4315_v61  ;;  %v4859_v51 = vld [vmem:[%s7435_s3 + $0x34] sm:$0xf0]  ;;  %v4954_v0 = vld [vmem:[%s7435_s3 + $0x32c] sm:$0xf0] }
 0x115   :  { %2628 = vmatpush.bf16.msra.mxu1 %v4171_v9  ;;  %v4206_v9 = vld [vmem:[%s7435_s3 + $0x1a8] sm:$0xf] }
 0x117   :  { %2600 = vmatpush.bf16.msrb.mxu3 %v4455_v7  ;;  %v4015_v7 = vor.u32 %v4859_v51, %v4014_v62  ;;  %v4960_v62 = vld [vmem:[%s7435_s3 + $0x364] sm:$0xf]  ;;  %v4424_v51 = vld [vmem:[%s7435_s3 + $0x370] sm:$0xf0] }
 0x118   :  { %2616 = vmatpush.bf16.msra.mxu0 %v4027_v17  ;;  %v4207_v17 = vor.u32 %v4907_v10, %v4206_v9  ;;  %2641 = vmatpush.bf16.msra.mxu2 %v4299_v11  ;;  %v4126_v10 = vld [vmem:[%s7435_s3 + $0x108] sm:$0xf]  ;;  %v4375_v11 = vor.u32 %v4950_v27, %v4374_v8 }
 0x119   :  { %2629 = vmatpush.bf16.msra.mxu1 %v4155_v20  ;;  %v4439_v20 = vor.u32 %v4966_v13, %v4438_v12  ;;  %v4488_v12 = vld [vmem:[%s7435_s3 + $0x3f0] sm:$0xf0] }
 0x11b   :  { %2601 = vmatpush.bf16.msrb.mxu3 %v4439_v20  ;;  %v4913_v20 = vld [vmem:[%s7435_s3 + $0x1ec] sm:$0xf] }
 0x11c   :  { %2617 = vmatpush.bf16.msra.mxu0 %v4011_v30  ;;  %v4191_v30 = vor.u32 %v4903_v26, %v4190_v25  ;;  %2642 = vmatpush.bf16.msra.mxu2 %v4283_v40  ;;  %v4127_v40 = vor.u32 %v4887_v14, %v4126_v10  ;;  %v4408_v10 = vld [vmem:[%s7435_s3 + $0x350] sm:$0xf0] }
 0x11d   :  { %2630 = vmatpush.bf16.msra.mxu1 %v4139_v38  ;;  %v4264_v38 = vld [vmem:[%s7435_s3 + $0x230] sm:$0xf0] }
 0x11e   :  { %v4267_v42 = vor.u32 %v4920_v35, %v4264_v38  ;;  %v4475_v35 = vor.u32 %v4972_v29, %v4472_v37  ;;  %v4909_v38 = vld [vmem:[%s7435_s3 + $0x1cc] sm:$0xf] }
 0x11f   :  { %2602 = vmatpush.bf16.msrb.mxu3 %v4423_v33  ;;  %v4096_v33 = vld [vmem:[%s7435_s3 + $0xd8] sm:$0xf0]  ;;  %v4227_v46 = vor.u32 %v4909_v38, %v4224_v36 }
 0x120   :  { %2618 = vmatpush.bf16.msra.mxu0 %v3995_v47  ;;  %v6876_v39 = vpop.f32.mrf.mxu0  ;;  %2643 = vmatpush.bf16.msra.mxu2 %v4267_v42  ;;  %v4407_v47 = vor.u32 %v4958_v49, %v4406_v48  ;;  %v4099_v63 = vor.u32 %v4877_v32, %v4096_v33  ;;  %v4456_v42 = vld [vmem:[%s7435_s3 + $0x3b0] sm:$0xf0]  ;;  %v4873_v48 = vld [vmem:[%s7435_s3 + $0xac] sm:$0xf]  ;;  %v4080_v49 = vld [vmem:[%s7435_s3 + $0xb8] sm:$0xf0] }
 0x121   :  { %2631 = vmatpush.bf16.msra.mxu1 %v4123_v52  ;;  %v6878_v44 = vpop.f32.mrf.mxu1  ;;  %v4248_v52 = vld [vmem:[%s7435_s3 + $0x210] sm:$0xf0]  ;;  %v4889_v33 = vld [vmem:[%s7435_s3 + $0x12c] sm:$0xf] }
 0x122   :  { %v4251_v54 = vor.u32 %v4916_v22, %v4248_v52  ;;  %v4440_v22 = vld [vmem:[%s7435_s3 + $0x390] sm:$0xf0]  ;;  %v4083_v52 = vor.u32 %v4873_v48, %v4080_v49 }
 0x123   :  { %2619 = vmatmul.bf16.vlgmr.msra.gmra.mxu0 %v6634_v31  ;;  %2603 = vmatpush.bf16.msrb.mxu3 %v4407_v47  ;;  %v4964_v47 = vld [vmem:[%s7435_s3 + $0x384] sm:$0xf]  ;;  %v4376_v48 = vld [vmem:[%s7435_s3 + $0x310] sm:$0xf0] }
 0x124   :  { %2663 = vmatpush.bf16.msrb.mxu0 %v4111_v18  ;;  %2632 = vmatmul.bf16.vlgmr.msra.gmra.mxu1 %v6717_v34  ;;  %v258_v18 = vperm.slane %v6419_v28, 2  ;;  %v4390_v28 = vld [vmem:[%s7435_s3 + $0x320] sm:$0xf] }
 0x125   :  { %2676 = vmatpush.bf16.msrb.mxu1 %v4239_v55  ;;  %2644 = vmatpush.bf16.msra.mxu2 %v4251_v54  ;;  %v4391_v4 = vor.u32 %v4954_v0, %v4390_v28  ;;  %v4064_v54 = vld [vmem:[%s7435_s3 + $0x98] sm:$0xf0]  ;;  %v4901_v28 = vld [vmem:[%s7435_s3 + $0x18c] sm:$0xf] }
 0x126   :  { %v1601_v61 = vadd.f32 %v6719_v15, %v258_v18  ;;  %v4855_v15 = vld [vmem:[%s7435_s3 + $0x14] sm:$0xf0] }
 0x127   :  { %2604 = vmatpush.bf16.msrb.mxu3 %v4391_v4 }
 0x128   :  { %2664 = vmatpush.bf16.msrb.mxu0 %v4095_v1  ;;  %v6905_v55 = vpop.f32.mrf.mxu2  ;;  %v4142_v1 = vld [vmem:[%s7435_s3 + $0x128] sm:$0xf]  ;;  %v1628_v3 = vpop.f32.mrf.mxu0  ;;  %v1614_v13 = vadd.f32 %v6724_v23, %v1601_v61  ;;  %v4240_v23 = vld [vmem:[%s7435_s3 + $0x1f8] sm:$0xf0] }
 0x129   :  { %2677 = vmatpush.bf16.msrb.mxu1 %v4223_v5  ;;  %v6907_v57 = vpop.f32.mrf.mxu3  ;;  %v3998_v5 = vld [vmem:[%s7435_s3 + $0x8] sm:$0xf]  ;;  %v1641_v6 = vpop.f32.mrf.mxu1  ;;  %v4143_v9 = vor.u32 %v4891_v2, %v4142_v1  ;;  %v4865_v1 = vld [vmem:[%s7435_s3 + $0x6c] sm:$0xf]  ;;  %v4048_v2 = vld [vmem:[%s7435_s3 + $0x78] sm:$0xf0]  ;;  %v4427_v3 = vor.u32 %v4960_v62, %v4424_v51 }
 0x12a   :  { %v3999_v25 = vor.u32 %v4855_v15, %v3998_v5  ;;  %v1627_v58 = vadd.f32 %v6876_v39, %v1614_v13  ;;  %v4968_v39 = vld [vmem:[%s7435_s3 + $0x3a4] sm:$0xf]  ;;  %v4897_v5 = vld [vmem:[%s7435_s3 + $0x16c] sm:$0xf]  ;;  %v4947_v15 = vld [vmem:[%s7435_s3 + $0x2f4] sm:$0xf0]  ;;  %v4051_v8 = vor.u32 %v4865_v1, %v4048_v2 }
 0x12b   :  { %2605 = vmatpush.bf16.msrb.mxu3 %v4375_v11  ;;  %v4459_v50 = vor.u32 %v4968_v39, %v4456_v42  ;;  %v4032_v13 = vld [vmem:[%s7435_s3 + $0x58] sm:$0xf0]  ;;  %v4939_v39 = vld [vmem:[%s7435_s3 + $0x2b4] sm:$0xf0]  ;;  %v4302_v51 = vld [vmem:[%s7435_s3 + $0x268] sm:$0xf] }
 0x12c   :  { %2665 = vmatpush.bf16.msrb.mxu0 %v4079_v16  ;;  %v4976_v16 = vld [vmem:[%s7435_s3 + $0x3e4] sm:$0xf]  ;;  %v4286_v2 = vld [vmem:[%s7435_s3 + $0x248] sm:$0xf] }
 0x12d   :  { %2678 = vmatpush.bf16.msrb.mxu1 %v4207_v17  ;;  %v4881_v17 = vld [vmem:[%s7435_s3 + $0xec] sm:$0xf]  ;;  %v4491_v43 = vor.u32 %v4976_v16, %v4488_v12 }
 0x12e   :  { %v4861_v12 = vld [vmem:[%s7435_s3 + $0x4c] sm:$0xf] }
 0x12f   :  { %2650 = vmatpush.bf16.msra.mxu3 %v4491_v43 }
 0x130   :  { %2666 = vmatpush.bf16.msrb.mxu0 %v4063_v41  ;;  %v1654_v24 = vpop.f32.mrf.mxu2  ;;  %v4115_v41 = vor.u32 %v4881_v17, %v4112_v21  ;;  %v4893_v17 = vld [vmem:[%s7435_s3 + $0x14c] sm:$0xf]  ;;  %v4160_v21 = vld [vmem:[%s7435_s3 + $0x158] sm:$0xf0] }
 0x131   :  { %2679 = vmatpush.bf16.msrb.mxu1 %v4191_v30  ;;  %v1667_v26 = vpop.f32.mrf.mxu3  ;;  %v4243_v30 = vor.u32 %v4913_v20, %v4240_v23  ;;  %v4350_v23 = vld [vmem:[%s7435_s3 + $0x2c8] sm:$0xf]  ;;  %v4943_v24 = vld [vmem:[%s7435_s3 + $0x2d4] sm:$0xf0] }
 0x132   :  { %v4952_v26 = vld [vmem:[%s7435_s3 + $0x324] sm:$0xf]  ;;  %v4351_v32 = vor.u32 %v4943_v24, %v4350_v23 }
 0x133   :  { %2651 = vmatpush.bf16.msra.mxu3 %v4475_v35  ;;  %v4144_v35 = vld [vmem:[%s7435_s3 + $0x138] sm:$0xf0] }
 0x134   :  { %2667 = vmatpush.bf16.msrb.mxu0 %v4047_v45  ;;  %v1640_v45 = vadd.f32 %v6878_v44, %v1627_v58  ;;  %v4208_v44 = vld [vmem:[%s7435_s3 + $0x1b8] sm:$0xf0]  ;;  %v4857_v58 = vld [vmem:[%s7435_s3 + $0x2c] sm:$0xf]  ;;  %v4147_v49 = vor.u32 %v4889_v33, %v4144_v35 }
 0x135   :  { %2680 = vmatpush.bf16.msrb.mxu1 %v4175_v60  ;;  %v4905_v60 = vld [vmem:[%s7435_s3 + $0x1ac] sm:$0xf] }
 0x136   :  { %v1653_v18 = vadd.f32 %v6905_v55, %v1640_v45  ;;  %v4211_v53 = vor.u32 %v4905_v60, %v4208_v44  ;;  %v4192_v55 = vld [vmem:[%s7435_s3 + $0x198] sm:$0xf0]  ;;  %v4853_v60 = vld [vmem:[%s7435_s3 + $0xc] sm:$0xf] }
 0x137   :  { %2652 = vmatpush.bf16.msra.mxu3 %v4459_v50  ;;  %v4195_v61 = vor.u32 %v4901_v28, %v4192_v55  ;;  %v4000_v50 = vld [vmem:[%s7435_s3 + $0x18] sm:$0xf0]  ;;  %v4933_v35 = vld [vmem:[%s7435_s3 + $0x28c] sm:$0xf] }
 0x138   :  { %2668 = vmatpush.bf16.msrb.mxu0 %v4031_v56  ;;  %v4443_v56 = vor.u32 %v4964_v47, %v4440_v22  ;;  %v1666_v0 = vadd.f32 %v6907_v57, %v1653_v18  ;;  %v4176_v57 = vld [vmem:[%s7435_s3 + $0x178] sm:$0xf0]  ;;  %v4885_v47 = vld [vmem:[%s7435_s3 + $0x10c] sm:$0xf]  ;;  %v4318_v18 = vld [vmem:[%s7435_s3 + $0x288] sm:$0xf] }
 0x139   :  { %2681 = vmatpush.bf16.msrb.mxu1 %v4159_v59  ;;  %v4067_v59 = vor.u32 %v4869_v19, %v4064_v54  ;;  %v4179_v16 = vor.u32 %v4897_v5, %v4176_v57  ;;  %v4128_v22 = vld [vmem:[%s7435_s3 + $0x118] sm:$0xf0]  ;;  %v4003_v19 = vor.u32 %v4853_v60, %v4000_v50  ;;  %v4270_v57 = vld [vmem:[%s7435_s3 + $0x228] sm:$0xf] }
 0x13a   :  { %v4131_v54 = vor.u32 %v4885_v47, %v4128_v22  ;;  %v4304_v60 = vld [vmem:[%s7435_s3 + $0x278] sm:$0xf0]  ;;  %v4462_v50 = vld [vmem:[%s7435_s3 + $0x3a8] sm:$0xf] }
 0x13b   :  { %2653 = vmatpush.bf16.msra.mxu3 %v4443_v56 }
 0x13c   :  { %2669 = vmatpush.bf16.msrb.mxu0 %v4015_v7  ;;  %v4366_v7 = vld [vmem:[%s7435_s3 + $0x2e8] sm:$0xf] }
 0x13d   :  { %2682 = vmatpush.bf16.msrb.mxu1 %v4143_v9  ;;  %v4956_v9 = vld [vmem:[%s7435_s3 + $0x344] sm:$0xf]  ;;  %v4367_v14 = vor.u32 %v4947_v15, %v4366_v7 }
 0x13e   :  { %v4411_v43 = vor.u32 %v4956_v9, %v4408_v10  ;;  %v4945_v9 = vld [vmem:[%s7435_s3 + $0x2ec] sm:$0xf]  ;;  %v4368_v10 = vld [vmem:[%s7435_s3 + $0x2f8] sm:$0xf0] }
 0x13f   :  { %2654 = vmatpush.bf16.msra.mxu3 %v4427_v3  ;;  %v4927_v3 = vld [vmem:[%s7435_s3 + $0x254] sm:$0xf0] }
 0x140   :  { %2670 = vmatpush.bf16.msrb.mxu0 %v3999_v25  ;;  %v1678_v4 = vpop.f32.mrf.mxu0  ;;  %v4035_v25 = vor.u32 %v4861_v12, %v4032_v13  ;;  %v4371_v12 = vor.u32 %v4945_v9, %v4368_v10  ;;  %v4941_v13 = vld [vmem:[%s7435_s3 + $0x2cc] sm:$0xf]  ;;  %v4496_v10 = vld [vmem:[%s7435_s3 + $0x3f8] sm:$0xf0] }
 0x141   :  { %2683 = vmatpush.bf16.msrb.mxu1 %v4127_v40  ;;  %v1679_v6 = vadd.f32 %v1678_v4, %v1666_v0  ;;  %v7049_v27 = vpop.f32.mrf.mxu1  ;;  %v4392_v40 = vld [vmem:[%s7435_s3 + $0x330] sm:$0xf0]  ;;  %v4931_v0 = vld [vmem:[%s7435_s3 + $0x274] sm:$0xf0]  ;;  %v4287_v4 = vor.u32 %v4927_v3, %v4286_v2  ;;  %v4414_v3 = vld [vmem:[%s7435_s3 + $0x348] sm:$0xf] }
 0x142   :  { %v4395_v36 = vor.u32 %v4952_v26, %v4392_v40  ;;  %v4937_v40 = vld [vmem:[%s7435_s3 + $0x2ac] sm:$0xf] }
 0x143   :  { %2671 = vmatmul.bf16.vlgmr.msrb.gmra.mxu0 %v6634_v31  ;;  %v1775_v11 = vmax.f32 %v1679_v6, 0.0  ;;  %2655 = vmatpush.bf16.msra.mxu3 %v4411_v43  ;;  %v4977_v9 = vld [vmem:[%s7435_s3 + $0x3ec] sm:$0xf] }
 0x144   :  { %2715 = vmatpush.bf16.msra.mxu0 %v4115_v41  ;;  %2684 = vmatmul.bf16.vlgmr.msrb.gmra.mxu1 %v6717_v34  ;;  %v4163_v41 = vor.u32 %v4893_v17, %v4160_v21 }
 0x145   :  { %2728 = vmatpush.bf16.msra.mxu1 %v4243_v30  ;;  %v7069_v20 = vpack.c.bf16 %v1775_v11, %v1775_v11  ;;  %v4016_v30 = vld [vmem:[%s7435_s3 + $0x38] sm:$0xf0] }
 0x146   :  { %v4019_v42 = vor.u32 %v4857_v58, %v4016_v30  ;;  %v4979_v58 = vld [vmem:[%s7435_s3 + $0x3f4] sm:$0xf0] }
 0x147   :  { %2593 = vmatmul.bf16.vlgmr.msrb.gmra.mxu2 %v7069_v20  ;;  %2656 = vmatpush.bf16.msra.mxu3 %v4395_v36 }
 0x148   :  { %2716 = vmatpush.bf16.msra.mxu0 %v4099_v63  ;;  %v1704_v29 = vpop.f32.mrf.mxu2  ;;  %2689 = vmatpush.bf16.msrb.mxu2 %v4367_v14  ;;  %v1680_v38 = vpop.f32.mrf.mxu0  ;;  %v4334_v63 = vld [vmem:[%s7435_s3 + $0x2a8] sm:$0xf]  ;;  %v4352_v14 = vld [vmem:[%s7435_s3 + $0x2d8] sm:$0xf0] }
 0x149   :  { %2729 = vmatpush.bf16.msra.mxu1 %v4227_v46  ;;  %v1717_v37 = vpop.f32.mrf.mxu3  ;;  %v1693_v45 = vpop.f32.mrf.mxu1  ;;  %v4948_v46 = vld [vmem:[%s7435_s3 + $0x304] sm:$0xf]  ;;  %v4335_v44 = vor.u32 %v4939_v39, %v4334_v63  ;;  %v4320_v38 = vld [vmem:[%s7435_s3 + $0x298] sm:$0xf0]  ;;  %v4478_v63 = vld [vmem:[%s7435_s3 + $0x3c8] sm:$0xf] }
 0x14a   :  { %v4975_v39 = vld [vmem:[%s7435_s3 + $0x3d4] sm:$0xf0] }
 0x14c   :  { %2717 = vmatpush.bf16.msra.mxu0 %v4083_v52  ;;  %2690 = vmatpush.bf16.msrb.mxu2 %v4351_v32  ;;  %v4379_v52 = vor.u32 %v4948_v46, %v4376_v48  ;;  %v4323_v46 = vor.u32 %v4933_v35, %v4320_v38  ;;  %v4479_v48 = vor.u32 %v4975_v39, %v4478_v63  ;;  %v4957_v35 = vld [vmem:[%s7435_s3 + $0x34c] sm:$0xf]  ;;  %v4416_v38 = vld [vmem:[%s7435_s3 + $0x358] sm:$0xf0] }
 0x14d   :  { %2730 = vmatpush.bf16.msra.mxu1 %v4211_v53  ;;  %v4935_v53 = vld [vmem:[%s7435_s3 + $0x294] sm:$0xf0]  ;;  %v4419_v39 = vor.u32 %v4957_v35, %v4416_v38 }
 0x14e   :  { %v4319_v55 = vor.u32 %v4935_v53, %v4318_v18  ;;  %2657 = vmatpush.bf16.msra.mxu3 %v4379_v52  ;;  %v4925_v52 = vld [vmem:[%s7435_s3 + $0x24c] sm:$0xf]  ;;  %v4288_v18 = vld [vmem:[%s7435_s3 + $0x258] sm:$0xf0]  ;;  %v4446_v53 = vld [vmem:[%s7435_s3 + $0x388] sm:$0xf] }
 0x150   :  { %2718 = vmatpush.bf16.msra.mxu0 %v4067_v59  ;;  %v1706_v56 = vpop.f32.mrf.mxu2  ;;  %2691 = vmatpush.bf16.msrb.mxu2 %v4335_v44  ;;  %v5013_v59 = vld [vmem:[%s7434_s2] sm:$0xf]  ;;  %v4971_v44 = vld [vmem:[%s7435_s3 + $0x3b4] sm:$0xf0] }
 0x151   :  { %2731 = vmatpush.bf16.msra.mxu1 %v4195_v61  ;;  %v1719_v28 = vpop.f32.mrf.mxu3  ;;  %v259_v62 = vperm.slane %v5013_v59, 3  ;;  %v4303_v61 = vor.u32 %v4931_v0, %v4302_v51  ;;  %v4463_v22 = vor.u32 %v4971_v44, %v4462_v50  ;;  %v4430_v59 = vld [vmem:[%s7435_s3 + $0x368] sm:$0xf]  ;;  %v4949_v50 = vld [vmem:[%s7435_s3 + $0x30c] sm:$0xf] }
 0x152   :  { %v4921_v28 = vld [vmem:[%s7435_s3 + $0x22c] sm:$0xf]  ;;  %v4384_v44 = vld [vmem:[%s7435_s3 + $0x318] sm:$0xf0] }
 0x153   :  { %v1692_v1 = vadd.f32 %v7049_v27, %v259_v62  ;;  %v4963_v62 = vld [vmem:[%s7435_s3 + $0x374] sm:$0xf0] }
 0x154   :  { %2719 = vmatpush.bf16.msra.mxu0 %v4051_v8  ;;  %2692 = vmatpush.bf16.msrb.mxu2 %v4319_v55  ;;  %v4919_v8 = vld [vmem:[%s7435_s3 + $0x214] sm:$0xf0]  ;;  %v4272_v55 = vld [vmem:[%s7435_s3 + $0x238] sm:$0xf0]  ;;  %v4431_v0 = vor.u32 %v4963_v62, %v4430_v59  ;;  %v4984_v62 = vld [vmem:[%s7437_s5 + $0x20] sm:$0xff] }
 0x155   :  { %2732 = vmatpush.bf16.msra.mxu1 %v4179_v16  ;;  %v1705_v5 = vadd.f32 %v1704_v29, %v1692_v1  ;;  %v4275_v51 = vor.u32 %v4921_v28, %v4272_v55  ;;  %v4256_v1 = vld [vmem:[%s7435_s3 + $0x218] sm:$0xf0]  ;;  %v4986_v28 = vld [vmem:[%s7437_s5 + $0x30] sm:$0xff] }
 0x157   :  { %2645 = vmatmul.bf16.vlgmr.msra.gmra.mxu2 %v7069_v20  ;;  %v1718_v7 = vadd.f32 %v1717_v37, %v1705_v5  ;;  %v4494_v37 = vld [vmem:[%s7435_s3 + $0x3e8] sm:$0xf] }
 0x158   :  { %2720 = vmatpush.bf16.msra.mxu0 %v4035_v25  ;;  %2693 = vmatpush.bf16.msrb.mxu2 %v4303_v61  ;;  %v4355_v25 = vor.u32 %v4941_v13, %v4352_v14  ;;  %v4495_v33 = vor.u32 %v4979_v58, %v4494_v37  ;;  %v4917_v61 = vld [vmem:[%s7435_s3 + $0x20c] sm:$0xf]  ;;  %v4432_v58 = vld [vmem:[%s7435_s3 + $0x378] sm:$0xf0] }
 0x159   :  { %2733 = vmatpush.bf16.msra.mxu1 %v4163_v41  ;;  %v4336_v41 = vld [vmem:[%s7435_s3 + $0x2b8] sm:$0xf0]  ;;  %v4259_v5 = vor.u32 %v4917_v61, %v4256_v1  ;;  %v4973_v13 = vld [vmem:[%s7435_s3 + $0x3cc] sm:$0xf]  ;;  %v4982_v1 = vld [vmem:[%s7437_s5 + $0x10] sm:$0xff] }
 0x15a   :  { %v4339_v32 = vor.u32 %v4937_v40, %v4336_v41  ;;  %v4448_v40 = vld [vmem:[%s7435_s3 + $0x398] sm:$0xf0]  ;;  %v4961_v37 = vld [vmem:[%s7435_s3 + $0x36c] sm:$0xf] }
 0x15c   :  { %2721 = vmatpush.bf16.msra.mxu0 %v4019_v42  ;;  %2694 = vmatpush.bf16.msrb.mxu2 %v4287_v4  ;;  %v4959_v4 = vld [vmem:[%s7435_s3 + $0x354] sm:$0xf0] }
 0x15d   :  { %2734 = vmatpush.bf16.msra.mxu1 %v4147_v49  ;;  %v4929_v49 = vld [vmem:[%s7435_s3 + $0x26c] sm:$0xf] }
 0x15e   :  { %v4307_v47 = vor.u32 %v4929_v49, %v4304_v60 }
 0x160   :  { %2722 = vmatpush.bf16.msra.mxu0 %v4003_v19  ;;  %v1730_v15 = vpop.f32.mrf.mxu0  ;;  %v4967_v19 = vld [vmem:[%s7435_s3 + $0x394] sm:$0xf0] }
 0x161   :  { %2735 = vmatpush.bf16.msra.mxu1 %v4131_v54  ;;  %v1743_v27 = vpop.f32.mrf.mxu1  ;;  %v1731_v11 = vadd.f32 %v1730_v15, %v1718_v7  ;;  %v4291_v54 = vor.u32 %v4925_v52, %v4288_v18  ;;  %v4447_v56 = vor.u32 %v4967_v19, %v4446_v53  ;;  %v7255_v15 = vld [vmem:[%s7436_s4] sm:$0xf]  ;;  %v4987_v53 = vld [vmem:[%s7437_s5 + $0x38] sm:$0xff] }
 0x162   :  { %v1913_v52 = vperm.slane %v7255_v15, 2 }
 0x163   :  { %2723 = vmatmul.bf16.vlgmr.msra.gmra.mxu0 %v6634_v31  ;;  %v4923_v31 = vld [vmem:[%s7435_s3 + $0x234] sm:$0xf0]  ;;  %v1744_v17 = vadd.f32 %v1743_v27, %v1731_v11  ;;  %v1911_v11 = vperm.slane %v7255_v15, 0 }
 0x164   :  { %2736 = vmatmul.bf16.vlgmr.msra.gmra.mxu1 %v6717_v34  ;;  %v4271_v6 = vor.u32 %v4923_v31, %v4270_v57  ;;  %v4254_v34 = vld [vmem:[%s7435_s3 + $0x208] sm:$0xf]  ;;  %v4415_v57 = vor.u32 %v4959_v4, %v4414_v3  ;;  %v4951_v27 = vld [vmem:[%s7435_s3 + $0x314] sm:$0xf0]  ;;  %3035 = vmatpush.bf16.msrb.mxu0 %v4987_v53  ;;  %v1914_v3 = vperm.slane %v7255_v15, 3  ;;  %v5004_v53 = vld [vmem:[%s7437_s5 + $0xc0] sm:$0xff] }
 0x165   :  { %v4255_v16 = vor.u32 %v4919_v8, %v4254_v34  ;;  %v4398_v31 = vld [vmem:[%s7435_s3 + $0x328] sm:$0xf] }
 0x166   :  { %2695 = vmatpush.bf16.msrb.mxu2 %v4271_v6  ;;  %v4955_v6 = vld [vmem:[%s7435_s3 + $0x334] sm:$0xf0]  ;;  %v4382_v8 = vld [vmem:[%s7435_s3 + $0x308] sm:$0xf] }
 0x167   :  { %v4399_v7 = vor.u32 %v4955_v6, %v4398_v31  ;;  %v4981_v4 = vld [vmem:[%s7437_s5 + $0x8] sm:$0xff] }
 0x168   :  { %v1756_v21 = vpop.f32.mrf.mxu2  ;;  %v1732_v24 = vpop.f32.mrf.mxu0  ;;  %3036 = vmatpush.bf16.msrb.mxu0 %v4986_v28 }
 0x169   :  { %v1757_v43 = vadd.f32 %v1756_v21, %v1744_v17  ;;  %v1769_v23 = vpop.f32.mrf.mxu3  ;;  %v1745_v26 = vpop.f32.mrf.mxu1  ;;  %v4464_v24 = vld [vmem:[%s7435_s3 + $0x3b8] sm:$0xf0] }
 0x16a   :  { %2696 = vmatpush.bf16.msrb.mxu2 %v4255_v16  ;;  %v4383_v16 = vor.u32 %v4951_v27, %v4382_v8  ;;  %v4965_v26 = vld [vmem:[%s7435_s3 + $0x38c] sm:$0xf]  ;;  %v4991_v27 = vld [vmem:[%s7437_s5 + $0x58] sm:$0xff] }
 0x16b   :  { %v1770_v29 = vadd.f32 %v1769_v23, %v1757_v43  ;;  %v4969_v23 = vld [vmem:[%s7435_s3 + $0x3ac] sm:$0xf] }
 0x16d   :  { %2697 = vmatmul.bf16.vlgmr.msrb.gmra.mxu2 %v7069_v20  ;;  %v1776_v30 = vmax.f32 %v1770_v29, 0.0  ;;  %v4451_v29 = vor.u32 %v4965_v26, %v4448_v40 }
 0x16e   :  { %2741 = vmatpush.bf16.msra.mxu2 %v4371_v12  ;;  %v4499_v12 = vor.u32 %v4977_v9, %v4496_v10  ;;  %v5003_v9 = vld [vmem:[%s7437_s5 + $0xb8] sm:$0xff]  ;;  %v4990_v10 = vld [vmem:[%s7437_s5 + $0x50] sm:$0xff] }
 0x16f   :  { %v7188_v36 = vpack.c.bf16 %v1776_v30, %v1776_v30  ;;  %v1912_v30 = vperm.slane %v7255_v15, 1  ;;  %v4992_v15 = vld [vmem:[%s7437_s5 + $0x60] sm:$0xff] }
 0x170   :  { %v1758_v42 = vpop.f32.mrf.mxu2 }
 0x171   :  { %v1771_v45 = vpop.f32.mrf.mxu3  ;;  %2606 = vmatmul.bf16.vlgmr.msrb.gmra.mxu3 %v7188_v36 }
 0x172   :  { %2742 = vmatpush.bf16.msra.mxu2 %v4355_v25  ;;  %2702 = vmatpush.bf16.msrb.mxu3 %v4495_v33  ;;  %v4467_v25 = vor.u32 %v4969_v23, %v4464_v24  ;;  %v4953_v45 = vld [vmem:[%s7435_s3 + $0x32c] sm:$0xf]  ;;  %v5000_v23 = vld [vmem:[%s7437_s5 + $0xa0] sm:$0xff]  ;;  %v4999_v24 = vld [vmem:[%s7437_s5 + $0x98] sm:$0xff] }
 0x176   :  { %2743 = vmatpush.bf16.msra.mxu2 %v4339_v32  ;;  %2703 = vmatpush.bf16.msrb.mxu3 %v4479_v48  ;;  %v4435_v32 = vor.u32 %v4961_v37, %v4432_v58 }
 0x17a   :  { %2744 = vmatpush.bf16.msra.mxu2 %v4323_v46  ;;  %2704 = vmatpush.bf16.msrb.mxu3 %v4463_v22  ;;  %v4400_v46 = vld [vmem:[%s7435_s3 + $0x338] sm:$0xf0] }
 0x17b   :  { %v4403_v49 = vor.u32 %v4953_v45, %v4400_v46 }
 0x17e   :  { %2745 = vmatpush.bf16.msra.mxu2 %v4307_v47  ;;  %2705 = vmatpush.bf16.msrb.mxu3 %v4447_v56  ;;  %v4387_v47 = vor.u32 %v4949_v50, %v4384_v44  ;;  %v5006_v44 = vld [vmem:[%s7437_s5 + $0xd0] sm:$0xff] }
 0x180   :  { %v2568_v2 = vpop.f32.mrf.mxu0 }
 0x181   :  { %2658 = vmatmul.bf16.vlgmr.msra.gmra.mxu3 %v7188_v36  ;;  %v2569_v14 = vadd.f32 %v2568_v2, %v1911_v11  ;;  %v4994_v2 = vld [vmem:[%s7437_s5 + $0x70] sm:$0xff] }
 0x182   :  { %2746 = vmatpush.bf16.msra.mxu2 %v4291_v54  ;;  %2706 = vmatpush.bf16.msrb.mxu3 %v4431_v0  ;;  %v4983_v0 = vld [vmem:[%s7437_s5 + $0x18] sm:$0xff]  ;;  %v5002_v11 = vld [vmem:[%s7437_s5 + $0xb0] sm:$0xff] }
 0x186   :  { %2747 = vmatpush.bf16.msra.mxu2 %v4275_v51  ;;  %2707 = vmatpush.bf16.msrb.mxu3 %v4415_v57  ;;  %v4995_v51 = vld [vmem:[%s7437_s5 + $0x78] sm:$0xff] }
 0x187   :  { %v2581_v17 = vpop.f32.mrf.mxu1  ;;  %3048 = vmatpush.bf16.msrb.mxu1 %v4995_v51 }
 0x188   :  { %v2570_v34 = vpop.f32.mrf.mxu0  ;;  %v7277_v43 = vadd.f32 %v2581_v17, %v2569_v14  ;;  %v5001_v14 = vld [vmem:[%s7437_s5 + $0xa8] sm:$0xff] }
 0x189   :  { %v4980_v34 = vld [vmem:[%s7437_s5] sm:$0xff] }
 0x18a   :  { %2748 = vmatpush.bf16.msra.mxu2 %v4259_v5  ;;  %2708 = vmatpush.bf16.msrb.mxu3 %v4399_v7  ;;  %v4993_v5 = vld [vmem:[%s7437_s5 + $0x68] sm:$0xff] }
 0x18b   :  { %3049 = vmatpush.bf16.msrb.mxu1 %v4994_v2 }
 0x18d   :  { %2749 = vmatmul.bf16.vlgmr.msra.gmra.mxu2 %v7069_v20  ;;  %v4480_v20 = vld [vmem:[%s7435_s3 + $0x3d8] sm:$0xf0] }
 0x18e   :  { %2709 = vmatpush.bf16.msrb.mxu3 %v4383_v16  ;;  %v4483_v21 = vor.u32 %v4973_v13, %v4480_v20  ;;  %3061 = vmatpush.bf16.msrb.mxu2 %v5003_v9  ;;  %v4989_v20 = vld [vmem:[%s7437_s5 + $0x48] sm:$0xff] }
 0x18f   :  { %v2583_v41 = vpop.f32.mrf.mxu1  ;;  %3050 = vmatpush.bf16.msrb.mxu1 %v4993_v5 }
 0x190   :  { %v4997_v41 = vld [vmem:[%s7437_s5 + $0x88] sm:$0xff] }
 0x191   :  { %2710 = vmatmul.bf16.vlgmr.msrb.gmra.mxu3 %v7188_v36 }
 0x192   :  { %2754 = vmatpush.bf16.msra.mxu3 %v4499_v12  ;;  %3062 = vmatpush.bf16.msrb.mxu2 %v5002_v11 }
 0x193   :  { %3051 = vmatpush.bf16.msrb.mxu1 %v4992_v15 }
 0x196   :  { %2755 = vmatpush.bf16.msra.mxu3 %v4483_v21  ;;  %3063 = vmatpush.bf16.msrb.mxu2 %v5001_v14  ;;  %v4988_v21 = vld [vmem:[%s7437_s5 + $0x40] sm:$0xff] }
 0x197   :  { %3052 = vmatpush.bf16.msrb.mxu1 %v4991_v27 }
 0x19a   :  { %2756 = vmatpush.bf16.msra.mxu3 %v4467_v25  ;;  %3064 = vmatpush.bf16.msrb.mxu2 %v5000_v23  ;;  %v4998_v25 = vld [vmem:[%s7437_s5 + $0x90] sm:$0xff] }
 0x19b   :  { %3053 = vmatpush.bf16.msrb.mxu1 %v4990_v10 }
 0x19e   :  { %2757 = vmatpush.bf16.msra.mxu3 %v4451_v29  ;;  %3065 = vmatpush.bf16.msrb.mxu2 %v4999_v24 }
 0x19f   :  { %3054 = vmatpush.bf16.msrb.mxu1 %v4989_v20 }
 0x1a0   :  { %v2620_v33 = vpop.f32.mrf.mxu0 }
 0x1a1   :  { %v2621_v63 = vadd.f32 %v2620_v33, %v1912_v30  ;;  %v2633_v42 = vpop.f32.mrf.mxu1  ;;  %v5011_v33 = vld [vmem:[%s7437_s5 + $0xf8] sm:$0xff] }
 0x1a2   :  { %2758 = vmatpush.bf16.msra.mxu3 %v4435_v32  ;;  %3066 = vmatpush.bf16.msrb.mxu2 %v4998_v25  ;;  %v4996_v32 = vld [vmem:[%s7437_s5 + $0x80] sm:$0xff] }
 0x1a3   :  { %v7311_v48 = vadd.f32 %v2633_v42, %v2621_v63  ;;  %3055 = vmatpush.bf16.msrb.mxu1 %v4988_v21  ;;  %v5009_v63 = vld [vmem:[%s7437_s5 + $0xe8] sm:$0xff] }
 0x1a6   :  { %2759 = vmatpush.bf16.msra.mxu3 %v4419_v39  ;;  %3067 = vmatpush.bf16.msrb.mxu2 %v4997_v41  ;;  %v5008_v39 = vld [vmem:[%s7437_s5 + $0xe0] sm:$0xff] }
 0x1a8   :  { %v2622_v60 = vpop.f32.mrf.mxu0 }
 0x1a9   :  { %v2635_v22 = vpop.f32.mrf.mxu1 }
 0x1aa   :  { %2760 = vmatpush.bf16.msra.mxu3 %v4403_v49  ;;  %3068 = vmatpush.bf16.msrb.mxu2 %v4996_v32  ;;  %v5007_v49 = vld [vmem:[%s7437_s5 + $0xd8] sm:$0xff] }
 0x1ae   :  { %2761 = vmatpush.bf16.msra.mxu3 %v4387_v47 }
 0x1b1   :  { %2762 = vmatmul.bf16.vlgmr.msra.gmra.mxu3 %v7188_v36  ;;  %v4985_v36 = vld [vmem:[%s7437_s5 + $0x28] sm:$0xff] }
 0x1b2   :  { %3037 = vmatpush.bf16.msrb.mxu0 %v4985_v36  ;;  %3074 = vmatpush.bf16.msrb.mxu3 %v5011_v33 }
 0x1b6   :  { %3038 = vmatpush.bf16.msrb.mxu0 %v4984_v62 }
 0x1ba   :  { %3039 = vmatpush.bf16.msrb.mxu0 %v4983_v0 }
 0x1be   :  { %3040 = vmatpush.bf16.msrb.mxu0 %v4982_v1 }
 0x1c0   :  { %v2672_v18 = vpop.f32.mrf.mxu0 }
 0x1c1   :  { %v2673_v19 = vadd.f32 %v2672_v18, %v1913_v52  ;;  %v2685_v54 = vpop.f32.mrf.mxu1 }
 0x1c2   :  { %3041 = vmatpush.bf16.msrb.mxu0 %v4981_v4 }
 0x1c3   :  { %v7324_v56 = vadd.f32 %v2685_v54, %v2673_v19 }
 0x1c6   :  { %3042 = vmatpush.bf16.msrb.mxu0 %v4980_v34 }
 0x1c8   :  { %v2674_v55 = vpop.f32.mrf.mxu0 }
 0x1c9   :  { %v2687_v59 = vpop.f32.mrf.mxu1 }
 0x1ca   :  { %v2594_v61 = vpop.f32.mrf.mxu2 }
 0x1cb   :  { %v2595_v40 = vadd.f32 %v2594_v61, %v7277_v43  ;;  %v5010_v43 = vld [vmem:[%s7437_s5 + $0xf0] sm:$0xff] }
 0x1cc   :  { %3075 = vmatpush.bf16.msrb.mxu3 %v5010_v43 }
 0x1d0   :  { %3076 = vmatpush.bf16.msrb.mxu3 %v5009_v63 }
 0x1d2   :  { %v2596_v31 = vpop.f32.mrf.mxu2 }
 0x1d3   :  { %v5012_v31 = vld [vmem:[%s7438_s6] ss:$0 sm:$0xff] }
 0x1d4   :  { %3077 = vmatpush.bf16.msrb.mxu3 %v5008_v39 }
 0x1d8   :  { %3078 = vmatpush.bf16.msrb.mxu3 %v5007_v49 }
 0x1da   :  { %v2646_v12 = vpop.f32.mrf.mxu2 }
 0x1db   :  { %v2647_v42 = vadd.f32 %v2646_v12, %v7311_v48  ;;  %v5005_v48 = vld [vmem:[%s7437_s5 + $0xc8] sm:$0xff] }
 0x1dc   :  { %3079 = vmatpush.bf16.msrb.mxu3 %v5006_v44 }
 0x1e0   :  { %v2724_v57 = vpop.f32.mrf.mxu0  ;;  %3080 = vmatpush.bf16.msrb.mxu3 %v5005_v48 }
 0x1e1   :  { %v2725_v6 = vadd.f32 %v2724_v57, %v1914_v3  ;;  %v2737_v7 = vpop.f32.mrf.mxu1 }
 0x1e2   :  { %v2648_v17 = vpop.f32.mrf.mxu2 }
 0x1e3   :  { %v7360_v8 = vadd.f32 %v2737_v7, %v2725_v6 }
 0x1e4   :  { %3081 = vmatpush.bf16.msrb.mxu3 %v5004_v53 }
 0x1e8   :  { %v2726_v16 = vpop.f32.mrf.mxu0 }
 0x1e9   :  { %v2739_v13 = vpop.f32.mrf.mxu1 }
 0x1f0   :  { %v2698_v26 = vpop.f32.mrf.mxu2 }
 0x1f1   :  { %v2699_v52 = vadd.f32 %v2698_v26, %v7324_v56 }
 0x1f4   :  { %v2607_v29 = vpop.f32.mrf.mxu3 }
 0x1f5   :  { %v2608_v37 = vadd.f32 %v2607_v29, %v2595_v40 }
 0x1f7   :  { %v2767_v30 = vmax.f32 %v2608_v37, 0.0 }
 0x1f8   :  { %v2700_v58 = vpop.f32.mrf.mxu2 }
 0x1f9   :  { %v2771_v35 = vpack.c.bf16 %v2767_v30, %v2767_v30 }
 0x1fb   :  { %3043 = vmatmul.bf16.vlgmr.msrb.gmra.mxu0 %v2771_v35 }
 0x1fc   :  { %v2609_v38 = vpop.f32.mrf.mxu3 }
 0x204   :  { %v2659_v45 = vpop.f32.mrf.mxu3 }
 0x205   :  { %v2660_v46 = vadd.f32 %v2659_v45, %v2647_v42 }
 0x207   :  { %v2768_v60 = vmax.f32 %v2660_v46, 0.0 }
 0x209   :  { %v2772_v50 = vpack.c.bf16 %v2768_v60, %v2768_v60 }
 0x20b   :  { %3056 = vmatmul.bf16.vlgmr.msrb.gmra.mxu1 %v2772_v50 }
 0x20c   :  { %v2661_v22 = vpop.f32.mrf.mxu3 }
 0x210   :  { %v2750_v47 = vpop.f32.mrf.mxu2 }
 0x211   :  { %v2751_v59 = vadd.f32 %v2750_v47, %v7360_v8 }
 0x214   :  { %v2711_v19 = vpop.f32.mrf.mxu3 }
 0x215   :  { %v2712_v54 = vadd.f32 %v2711_v19, %v2699_v52 }
 0x217   :  { %v2769_v28 = vmax.f32 %v2712_v54, 0.0 }
 0x218   :  { %v2752_v18 = vpop.f32.mrf.mxu2 }
 0x219   :  { %v2773_v55 = vpack.c.bf16 %v2769_v28, %v2769_v28 }
 0x21b   :  { %3069 = vmatmul.bf16.vlgmr.msrb.gmra.mxu2 %v2773_v55 }
 0x21c   :  { %v2713_v36 = vpop.f32.mrf.mxu3 }
 0x234   :  { %v2763_v62 = vpop.f32.mrf.mxu3 }
 0x235   :  { %v2764_v51 = vadd.f32 %v2763_v62, %v2751_v59 }
 0x237   :  { %v2770_v0 = vmax.f32 %v2764_v51, 0.0 }
 0x239   :  { %v2774_v61 = vpack.c.bf16 %v2770_v0, %v2770_v0 }
 0x23b   :  { %3082 = vmatmul.bf16.vlgmr.msrb.gmra.mxu3 %v2774_v61 }
 0x23c   :  { %v2765_v56 = vpop.f32.mrf.mxu3 }
 0x278   :  { %v3044_v1 = vpop.f32.mrf.mxu0 }
 0x279   :  { %v3045_v6 = vadd.f32 %v5012_v31, %v3044_v1 }
 0x280   :  { %v3046_v2 = vpop.f32.mrf.mxu0 }
 0x288   :  { %v3057_v3 = vpop.f32.mrf.mxu1 }
 0x289   :  { %v3058_v7 = vadd.f32 %v3057_v3, %v3045_v6 }
 0x290   :  { %v3059_v4 = vpop.f32.mrf.mxu1 }
 0x29e   :  { %v3070_v5 = vpop.f32.mrf.mxu2 }
 0x29f   :  { %v3071_v34 = vadd.f32 %v3070_v5, %v3058_v7 }
 0x2a6   :  { %v3072_v57 = vpop.f32.mrf.mxu2 }
 0x2be   :  { %v3083_v15 = vpop.f32.mrf.mxu3 }
 0x2bf   :  { %v3084_v8 = vadd.f32 %v3083_v15, %v3071_v34 }
 0x2c1   :  { %3087 = vst [vmem:[%s7439_s7] sm:$0xff] %v3084_v8 }
 0x2c6   :  { %v3085_v27 = vpop.f32.mrf.mxu3 }

</bundles_post_ra>
